<compile_context>
chip_gen: v7x
topology: tpu7x:2x2x1
jax: 0.10.0
libtpu: 0.0.40
codegen_flags: <defaults>
</compile_context>

<pallas_src>
import jax
import jax.numpy as jnp
from jax.experimental import pallas as pl
from jax.experimental.pallas import tpu as pltpu


def _round_up(x, m):
    return (x + m - 1) // m * m


def _pick_tile(mp, cap):
    """Largest multiple of 128 that divides mp (mp is a multiple of 128) and is <= cap."""
    q = mp // 128
    d = max(1, min(q, cap // 128))
    while q % d:
        d -= 1
    return 128 * d


def _compiler_params(est_block_bytes, semantics):
    # Double-buffered blocks + f32 in-kernel temps headroom; clamp below v7x's
    # 64 MiB physical VMEM, never below the largest default scoped limit.
    vmem = max(32 << 20, min(int(3 * est_block_bytes) + (8 << 20), 56 << 20))
    return pltpu.CompilerParams(dimension_semantics=semantics,
                                vmem_limit_bytes=vmem)


# ---------------------------------------------------------------------------
# 3x3 / stride-2 / pad-1 conv (+BN+SiLU), optionally fused with a following
# 1x1 conv (+BN+SiLU).  Input is pre-split into 4 space-to-depth phases that
# are top/left zero-padded and flattened with a junk column so every tap is a
# static lane-offset window of the same length inside the kernel.
# ---------------------------------------------------------------------------
# tap index (0..2) along one axis -> (input parity, window shift in the padded phase)
_TAP_PHASE_SHIFT = {0: (1, 0), 1: (0, 1), 2: (1, 1)}


def _make_phases(x, dtype):
    """x: (N,C,H,W), H & W even.  Returns 4 flattened padded phases + geometry."""
    N, C, H, W = x.shape
    Ho, Wo = H // 2, W // 2
    Wu = Wo + 1                       # row stride shared by phases and (junk-extended) output
    Mo = Ho * Wu                      # output length incl. one junk column per row
    Lq = _round_up((Ho + 1) * Wu + 1, 128)
    x = x.astype(dtype)               # cast BEFORE materializing (halves the dominant stream)
    qs = []
    for a in (0, 1):
        for b in (0, 1):
            p = x[:, :, a::2, b::2]                                  # (N,C,Ho,Wo)
            q = jnp.pad(p, ((0, 0), (0, 0), (1, 0), (1, 0)))         # (N,C,Ho+1,Wu)
            q = q.reshape(N, C, (Ho + 1) * Wu)
            qs.append(jnp.pad(q, ((0, 0), (0, 0), (0, Lq - q.shape[-1]))))
    return qs, Ho, Wo, Wu, Mo, Lq


def _make_conv3x3_kernel(Wu, Mo, fuse_pw):
    taps = []
    for ky in range(3):
        a, ry = _TAP_PHASE_SHIFT[ky]
        for kx in range(3):
            b, rx = _TAP_PHASE_SHIFT[kx]
            taps.append((2 * a + b, ry * Wu + rx))   # (phase index, flat lane offset)

    def _accumulate(q_refs, w_ref):
        acc = None
        for t, (p, off) in enumerate(taps):
            xt = q_refs[p][0, :, off:off + Mo]                       # (C_in, Mo) static window
            part = jnp.dot(w_ref[t], xt, preferred_element_type=jnp.float32)
            acc = part if acc is None else acc + part
        return acc                                                   # (C_out, Mo) f32

    if fuse_pw:
        def kernel(q00, q01, q10, q11, w_ref, b_ref, w2_ref, b2_ref, o1_ref, o2_ref):
            y1 = _accumulate((q00, q01, q10, q11), w_ref) + b_ref[...]
            s1 = y1 * jax.nn.sigmoid(y1)                             # SiLU, f32 epilogue
            o1_ref[0] = s1.astype(o1_ref.dtype)
            w2 = w2_ref[...]
            y2 = jnp.dot(w2, s1.astype(w2.dtype),
                         preferred_element_type=jnp.float32) + b2_ref[...]
            o2_ref[0] = (y2 * jax.nn.sigmoid(y2)).astype(o2_ref.dtype)
        return kernel

    def kernel(q00, q01, q10, q11, w_ref, b_ref, o_ref):
        y = _accumulate((q00, q01, q10, q11), w_ref) + b_ref[...]
        o_ref[0] = (y * jax.nn.sigmoid(y)).astype(o_ref.dtype)
    return kernel


def _conv3x3_s2_bn_silu(x, w, gamma, beta, mean, var, *, pw=None, eps=1e-5,
                        compute_dtype=jnp.bfloat16, act_dtype=jnp.bfloat16):
    """3x3/s2/p1 Conv+BN+SiLU; optionally fuse a following 1x1 Conv+BN+SiLU (pw params).

    Returns flattened (junk-column) channel-major outputs plus (Ho, Wo, Wu)."""
    N, C_in, H, W = x.shape
    C_out = w.shape[0]
    if (H % 2) or (W % 2):            # bottom/right zero pad == the conv's implicit zero pad
        x = jnp.pad(x, ((0, 0), (0, 0), (0, H % 2), (0, W % 2)))
        _, _, H, W = x.shape
    qs, Ho, Wo, Wu, Mo, Lq = _make_phases(x, compute_dtype)

    scale = gamma / jnp.sqrt(var + eps)
    w_taps = (jnp.transpose(w, (2, 3, 0, 1)).reshape(9, C_out, C_in)
              * scale[None, :, None]).astype(compute_dtype)          # BN scale folded in
    shift = (beta - mean * scale).reshape(C_out, 1).astype(jnp.float32)

    in_specs = [pl.BlockSpec((1, C_in, Lq), lambda n: (n, 0, 0)) for _ in range(4)]
    in_specs += [pl.BlockSpec((9, C_out, C_in), lambda n: (0, 0, 0)),   # resident weights
                 pl.BlockSpec((C_out, 1), lambda n: (0, 0))]            # resident BN shift
    operands = list(qs) + [w_taps, shift]

    itemsize = jnp.dtype(compute_dtype).itemsize
    est = 4 * C_in * Lq * itemsize + C_out * Mo * (itemsize + 4)

    if pw is not None:
        w2, g2, b2, m2, v2 = pw
        C_pw = w2.shape[0]
        scale2 = g2 / jnp.sqrt(v2 + eps)
        w2f = (w2.reshape(C_pw, C_out) * scale2[:, None]).astype(compute_dtype)
        shift2 = (b2 - m2 * scale2).reshape(C_pw, 1).astype(jnp.float32)
        in_specs += [pl.BlockSpec((C_pw, C_out), lambda n: (0, 0)),
                     pl.BlockSpec((C_pw, 1), lambda n: (0, 0))]
        operands += [w2f, shift2]
        out_shape = (jax.ShapeDtypeStruct((N, C_out, Mo), act_dtype),
                     jax.ShapeDtypeStruct((N, C_pw, Mo), act_dtype))
        out_specs = (pl.BlockSpec((1, C_out, Mo), lambda n: (n, 0, 0)),
                     pl.BlockSpec((1, C_pw, Mo), lambda n: (n, 0, 0)))
        est += C_pw * Mo * (itemsize + 4)
    else:
        out_shape = jax.ShapeDtypeStruct((N, C_out, Mo), act_dtype)
        out_specs = pl.BlockSpec((1, C_out, Mo), lambda n: (n, 0, 0))

    out = pl.pallas_call(
        _make_conv3x3_kernel(Wu, Mo, fuse_pw=pw is not None),
        out_shape=out_shape,
        grid=(N,),
        in_specs=in_specs,
        out_specs=out_specs,
        compiler_params=_compiler_params(est, ("parallel",)),
    )(*operands)

    geom = (Ho, Wo, Wu)
    if pw is not None:
        return out[0], out[1], geom
    return out, geom


# ---------------------------------------------------------------------------
# Two-input pointwise (1x1) Conv+BN+SiLU: y = SiLU(Wa@xa + Wb@xb + shift).
# Replaces Conv1x1(concat(xa, xb)) without materializing the concat.
# ---------------------------------------------------------------------------
def _pw2_kernel(xa_ref, xb_ref, wa_ref, wb_ref, b_ref, o_ref):
    y = (jnp.dot(wa_ref[...], xa_ref[0], preferred_element_type=jnp.float32)
         + jnp.dot(wb_ref[...], xb_ref[0], preferred_element_type=jnp.float32)
         + b_ref[...])
    o_ref[0] = (y * jax.nn.sigmoid(y)).astype(o_ref.dtype)


def _pw2_bn_silu(xa, xb, w, gamma, beta, mean, var, *, eps=1e-5,
                 compute_dtype=jnp.bfloat16, out_dtype=jnp.float32, tm_cap=2048):
    """xa, xb: (N, Ca, M) / (N, Cb, M) channel-major; w: (C_out, Ca+Cb, 1, 1)."""
    N, Ca, M = xa.shape
    Cb = xb.shape[1]
    C_out = w.shape[0]

    scale = gamma / jnp.sqrt(var + eps)
    w2 = w.reshape(C_out, Ca + Cb) * scale[:, None]
    wa = w2[:, :Ca].astype(compute_dtype)
    wb = w2[:, Ca:].astype(compute_dtype)
    shift = (beta - mean * scale).reshape(C_out, 1).astype(jnp.float32)

    xa = xa.astype(compute_dtype)
    xb = xb.astype(compute_dtype)
    Mp = _round_up(M, 128)            # pad is <=127 lanes; tm divides Mp exactly (no masked edges)
    if Mp != M:
        xa = jnp.pad(xa, ((0, 0), (0, 0), (0, Mp - M)))
        xb = jnp.pad(xb, ((0, 0), (0, 0), (0, Mp - M)))
    tm = _pick_tile(Mp, tm_cap)

    itemsize = jnp.dtype(compute_dtype).itemsize
    est = (Ca + Cb) * tm * itemsize + C_out * tm * (jnp.dtype(out_dtype).itemsize + 4)

    out = pl.pallas_call(
        _pw2_kernel,
        out_shape=jax.ShapeDtypeStruct((N, C_out, Mp), out_dtype),
        grid=(N, Mp // tm),
        in_specs=[
            pl.BlockSpec((1, Ca, tm), lambda n, j: (n, 0, j)),
            pl.BlockSpec((1, Cb, tm), lambda n, j: (n, 0, j)),
            pl.BlockSpec((C_out, Ca), lambda n, j: (0, 0)),
            pl.BlockSpec((C_out, Cb), lambda n, j: (0, 0)),
            pl.BlockSpec((C_out, 1), lambda n, j: (0, 0)),
        ],
        out_specs=pl.BlockSpec((1, C_out, tm), lambda n, j: (n, 0, j)),
        compiler_params=_compiler_params(est, ("parallel", "parallel")),
    )(xa, xb, wa, wb, shift)
    return out[:, :, :M]


# ---------------------------------------------------------------------------
# Wrapper glue (XLA): layout helpers and the 2x2 ceil-mode max pool.
# ---------------------------------------------------------------------------
def _unflatten(a, Ho, Wo, Wu):
    """(N, C, Ho*Wu) flattened with junk columns -> (N, C, Ho, Wo) NCHW."""
    N, C, _ = a.shape
    return a[:, :, :Ho * Wu].reshape(N, C, Ho, Wu)[..., :Wo]


def _maxpool2x2_ceil_flat(x, Ho2, Wo2, Wu2):
    """MaxPool2d(k=2, s=2, ceil_mode=True) on NCHW, emitted in the flattened
    junk-column layout (width Wu2) used by the 3x3 conv outputs."""
    N, C, H, W = x.shape
    xp = jnp.pad(x, ((0, 0), (0, 0), (0, 2 * Ho2 - H), (0, 2 * Wo2 - W)),
                 constant_values=-jnp.inf)
    p = xp.reshape(N, C, Ho2, 2, Wo2, 2).max(axis=(3, 5))
    p = jnp.pad(p, ((0, 0), (0, 0), (0, 0), (0, Wu2 - Wo2)))
    return p.reshape(N, C, Ho2 * Wu2)


# ---------------------------------------------------------------------------
# StemBlock forward.
# ---------------------------------------------------------------------------
def stem_block_forward(x, params, *, compute_dtype=jnp.bfloat16, act_dtype=None):
    """params[name] = (w, gamma, beta, running_mean, running_var)."""
    if act_dtype is None:
        act_dtype = compute_dtype

    # stem_1 (3x3/s2) with stem_2a (1x1) fused into the same kernel (2 outputs).
    s1f, s2af, (Ho, Wo, Wu) = _conv3x3_s2_bn_silu(
        x, *params["stem_1"], pw=params["stem_2a"],
        compute_dtype=compute_dtype, act_dtype=act_dtype)
    s1 = _unflatten(s1f, Ho, Wo, Wu)
    s2a = _unflatten(s2af, Ho, Wo, Wu)

    # stem_2b (3x3/s2) on the fused stem_2a output.
    s2bf, (Ho2, Wo2, Wu2) = _conv3x3_s2_bn_silu(
        s2a, *params["stem_2b"], compute_dtype=compute_dtype, act_dtype=act_dtype)

    # stem_2p: ceil-mode 2x2 max pool on s1, emitted directly in s2b's layout.
    s2pf = _maxpool2x2_ceil_flat(s1, Ho2, Wo2, Wu2).astype(act_dtype)

    # stem_3: 1x1 conv on concat(s2b, s2p) without materializing the concat.
    outf = _pw2_bn_silu(s2bf, s2pf, *params["stem_3"],
                        compute_dtype=compute_dtype, out_dtype=x.dtype)
    return _unflatten(outf, Ho2, Wo2, Wu2)


# ---------------------------------------------------------------------------
# Pure-JAX reference (lax.conv / reduce_window) for correctness checking.
# ---------------------------------------------------------------------------
def _conv_bn_silu_ref(x, w, gamma, beta, mean, var, *, stride, pad, eps=1e-5):
    y = jax.lax.conv_general_dilated(
        x, w, window_strides=(stride, stride),
        padding=[(pad, pad), (pad, pad)],
        dimension_numbers=("NCHW", "OIHW", "NCHW"))
    s = gamma / jnp.sqrt(var + eps)
    y = y * s[None, :, None, None] + (beta - mean * s)[None, :, None, None]
    return y * jax.nn.sigmoid(y)


def _maxpool_ref(x):
    N, C, H, W = x.shape
    return jax.lax.reduce_window(
        x, -jnp.inf, jax.lax.max,
        window_dimensions=(1, 1, 2, 2), window_strides=(1, 1, 2, 2),
        padding=[(0, 0), (0, 0), (0, (-H) % 2), (0, (-W) % 2)])


def _stem_ref(x, p):
    s1 = _conv_bn_silu_ref(x, *p["stem_1"], stride=2, pad=1)
    s2a = _conv_bn_silu_ref(s1, *p["stem_2a"], stride=1, pad=0)
    s2b = _conv_bn_silu_ref(s2a, *p["stem_2b"], stride=2, pad=1)
    s2p = _maxpool_ref(s1)
    return _conv_bn_silu_ref(jnp.concatenate([s2b, s2p], axis=1),
                             *p["stem_3"], stride=1, pad=0)


if __name__ == "__main__":
    # Small shapes consistent with StemBlock: batch=2, c1=4, H=W=16, c2=16.
    N, C1, H, W = 2, 4, 16, 16
    C2 = 16

    def make_conv_params(key, c_out, c_in, k):
        kw, kg, kb, km, kv = jax.random.split(key, 5)
        w = 0.1 * jax.random.normal(kw, (c_out, c_in, k, k), jnp.float32)
        gamma = 1.0 + 0.1 * jax.random.normal(kg, (c_out,), jnp.float32)
        beta = 0.1 * jax.random.normal(kb, (c_out,), jnp.float32)
        mean = 0.1 * jax.random.normal(km, (c_out,), jnp.float32)
        var = jnp.abs(1.0 + 0.1 * jax.random.normal(kv, (c_out,), jnp.float32))
        return (w, gamma, beta, mean, var)

    key = jax.random.PRNGKey(0)
    kx, k1, k2a, k2b, k3 = jax.random.split(key, 5)
    x = jax.random.normal(kx, (N, C1, H, W), dtype=jnp.float32)
    params = {
        "stem_1": make_conv_params(k1, C2, C1, 3),
        "stem_2a": make_conv_params(k2a, C2 // 2, C2, 1),
        "stem_2b": make_conv_params(k2b, C2, C2 // 2, 3),
        "stem_3": make_conv_params(k3, C2, 2 * C2, 1),
    }

    ref = _stem_ref(x, params)

    # Production path: bf16 streaming + bf16 intermediates (f32 accumulate/epilogue).
    out = jax.block_until_ready(jax.jit(stem_block_forward)(x, params))
    assert out.shape == (N, C2, H // 4, W // 4), out.shape
    assert out.dtype == x.dtype, out.dtype
    err_bf16 = float(jnp.max(jnp.abs(out - ref)))
    assert err_bf16 < 8e-2, err_bf16

    # Full-f32 path for a tight structural check against the XLA reference.
    out32 = jax.block_until_ready(
        jax.jit(lambda xx, pp: stem_block_forward(xx, pp,
                                                  compute_dtype=jnp.float32))(x, params))
    err_f32 = float(jnp.max(jnp.abs(out32 - ref)))
    assert err_f32 < 1e-4, err_f32

    print("KERNEL_OK")
</pallas_src>

<mosaic_0001>
module attributes {stable_mosaic.version = 11 : i64} {
  func.func @kernel(%arg0: i32, %arg1: memref<1x4x128xbf16, #tpu.memory_space<vmem>>, %arg2: memref<1x4x128xbf16, #tpu.memory_space<vmem>>, %arg3: memref<1x4x128xbf16, #tpu.memory_space<vmem>>, %arg4: memref<1x4x128xbf16, #tpu.memory_space<vmem>>, %arg5: memref<9x16x4xbf16, #tpu.memory_space<vmem>>, %arg6: memref<16x1xf32, #tpu.memory_space<vmem>>, %arg7: memref<8x16xbf16, #tpu.memory_space<vmem>>, %arg8: memref<8x1xf32, #tpu.memory_space<vmem>>, %arg9: memref<1x16x72xbf16, #tpu.memory_space<vmem>>, %arg10: memref<1x8x72xbf16, #tpu.memory_space<vmem>>) attributes {dimension_semantics = [#tpu.dimension_semantics<parallel>], iteration_bounds = array<i64: 2>, scalar_prefetch = 0 : i64, scratch_operands = 0 : i64, tpu.core_type = #tpu.core_type<tc>, window_params = [{transform_indices = @transform_0, window_bounds = array<i64: 1, 4, 128>}, {transform_indices = @transform_1, window_bounds = array<i64: 1, 4, 128>}, {transform_indices = @transform_2, window_bounds = array<i64: 1, 4, 128>}, {transform_indices = @transform_3, window_bounds = array<i64: 1, 4, 128>}, {pipeline_mode = #tpu.pipeline_mode<synchronous>, transform_indices = @transform_4, window_bounds = array<i64: 9, 16, 4>}, {pipeline_mode = #tpu.pipeline_mode<synchronous>, transform_indices = @transform_5, window_bounds = array<i64: 16, 1>}, {pipeline_mode = #tpu.pipeline_mode<synchronous>, transform_indices = @transform_6, window_bounds = array<i64: 8, 16>}, {pipeline_mode = #tpu.pipeline_mode<synchronous>, transform_indices = @transform_7, window_bounds = array<i64: 8, 1>}, {transform_indices = @transform_8, window_bounds = array<i64: 1, 16, 72>}, {transform_indices = @transform_9, window_bounds = array<i64: 1, 8, 72>}]} {
    %c0 = arith.constant 0 : index
    %c0_0 = arith.constant 0 : index
    %c0_1 = arith.constant 0 : index
    %0 = vector.load %arg4[%c0, %c0_0, %c0_1] : memref<1x4x128xbf16, #tpu.memory_space<vmem>>, vector<1x4x72xbf16>
    %1 = vector.shape_cast %0 : vector<1x4x72xbf16> to vector<4x72xbf16>
    %c0_2 = arith.constant 0 : index
    %c0_3 = arith.constant 0 : index
    %c0_4 = arith.constant 0 : index
    %2 = vector.load %arg5[%c0_2, %c0_3, %c0_4] : memref<9x16x4xbf16, #tpu.memory_space<vmem>>, vector<1x16x4xbf16>
    %3 = vector.shape_cast %2 : vector<1x16x4xbf16> to vector<16x4xbf16>
    %cst = arith.constant dense<0.000000e+00> : vector<16x72xf32>
    %4 = tpu.matmul %3, %1, %cst {dimension_numbers = #tpu.dot_dimension_numbers<[1], [0], [0], [1], [0, 0, 1, 1], [], []>} : vector<16x4xbf16>, vector<4x72xbf16>, vector<16x72xf32> -> vector<16x72xf32>
    %c0_5 = arith.constant 0 : index
    %c0_6 = arith.constant 0 : index
    %c1 = arith.constant 1 : index
    %5 = vector.load %arg3[%c0_5, %c0_6, %c1] : memref<1x4x128xbf16, #tpu.memory_space<vmem>>, vector<1x4x72xbf16>
    %6 = vector.shape_cast %5 : vector<1x4x72xbf16> to vector<4x72xbf16>
    %c1_7 = arith.constant 1 : index
    %c0_8 = arith.constant 0 : index
    %c0_9 = arith.constant 0 : index
    %7 = vector.load %arg5[%c1_7, %c0_8, %c0_9] : memref<9x16x4xbf16, #tpu.memory_space<vmem>>, vector<1x16x4xbf16>
    %8 = vector.shape_cast %7 : vector<1x16x4xbf16> to vector<16x4xbf16>
    %cst_10 = arith.constant dense<0.000000e+00> : vector<16x72xf32>
    %9 = tpu.matmul %8, %6, %cst_10 {dimension_numbers = #tpu.dot_dimension_numbers<[1], [0], [0], [1], [0, 0, 1, 1], [], []>} : vector<16x4xbf16>, vector<4x72xbf16>, vector<16x72xf32> -> vector<16x72xf32>
    %10 = arith.addf %4, %9 : vector<16x72xf32>
    %c0_11 = arith.constant 0 : index
    %c0_12 = arith.constant 0 : index
    %c1_13 = arith.constant 1 : index
    %11 = vector.load %arg4[%c0_11, %c0_12, %c1_13] : memref<1x4x128xbf16, #tpu.memory_space<vmem>>, vector<1x4x72xbf16>
    %12 = vector.shape_cast %11 : vector<1x4x72xbf16> to vector<4x72xbf16>
    %c2 = arith.constant 2 : index
    %c0_14 = arith.constant 0 : index
    %c0_15 = arith.constant 0 : index
    %13 = vector.load %arg5[%c2, %c0_14, %c0_15] : memref<9x16x4xbf16, #tpu.memory_space<vmem>>, vector<1x16x4xbf16>
    %14 = vector.shape_cast %13 : vector<1x16x4xbf16> to vector<16x4xbf16>
    %cst_16 = arith.constant dense<0.000000e+00> : vector<16x72xf32>
    %15 = tpu.matmul %14, %12, %cst_16 {dimension_numbers = #tpu.dot_dimension_numbers<[1], [0], [0], [1], [0, 0, 1, 1], [], []>} : vector<16x4xbf16>, vector<4x72xbf16>, vector<16x72xf32> -> vector<16x72xf32>
    %16 = arith.addf %10, %15 : vector<16x72xf32>
    %c0_17 = arith.constant 0 : index
    %c0_18 = arith.constant 0 : index
    %c9 = arith.constant 9 : index
    %17 = vector.load %arg2[%c0_17, %c0_18, %c9] : memref<1x4x128xbf16, #tpu.memory_space<vmem>>, vector<1x4x72xbf16>
    %18 = vector.shape_cast %17 : vector<1x4x72xbf16> to vector<4x72xbf16>
    %c3 = arith.constant 3 : index
    %c0_19 = arith.constant 0 : index
    %c0_20 = arith.constant 0 : index
    %19 = vector.load %arg5[%c3, %c0_19, %c0_20] : memref<9x16x4xbf16, #tpu.memory_space<vmem>>, vector<1x16x4xbf16>
    %20 = vector.shape_cast %19 : vector<1x16x4xbf16> to vector<16x4xbf16>
    %cst_21 = arith.constant dense<0.000000e+00> : vector<16x72xf32>
    %21 = tpu.matmul %20, %18, %cst_21 {dimension_numbers = #tpu.dot_dimension_numbers<[1], [0], [0], [1], [0, 0, 1, 1], [], []>} : vector<16x4xbf16>, vector<4x72xbf16>, vector<16x72xf32> -> vector<16x72xf32>
    %22 = arith.addf %16, %21 : vector<16x72xf32>
    %c0_22 = arith.constant 0 : index
    %c0_23 = arith.constant 0 : index
    %c10 = arith.constant 10 : index
    %23 = vector.load %arg1[%c0_22, %c0_23, %c10] : memref<1x4x128xbf16, #tpu.memory_space<vmem>>, vector<1x4x72xbf16>
    %24 = vector.shape_cast %23 : vector<1x4x72xbf16> to vector<4x72xbf16>
    %c4 = arith.constant 4 : index
    %c0_24 = arith.constant 0 : index
    %c0_25 = arith.constant 0 : index
    %25 = vector.load %arg5[%c4, %c0_24, %c0_25] : memref<9x16x4xbf16, #tpu.memory_space<vmem>>, vector<1x16x4xbf16>
    %26 = vector.shape_cast %25 : vector<1x16x4xbf16> to vector<16x4xbf16>
    %cst_26 = arith.constant dense<0.000000e+00> : vector<16x72xf32>
    %27 = tpu.matmul %26, %24, %cst_26 {dimension_numbers = #tpu.dot_dimension_numbers<[1], [0], [0], [1], [0, 0, 1, 1], [], []>} : vector<16x4xbf16>, vector<4x72xbf16>, vector<16x72xf32> -> vector<16x72xf32>
    %28 = arith.addf %22, %27 : vector<16x72xf32>
    %c0_27 = arith.constant 0 : index
    %c0_28 = arith.constant 0 : index
    %c10_29 = arith.constant 10 : index
    %29 = vector.load %arg2[%c0_27, %c0_28, %c10_29] : memref<1x4x128xbf16, #tpu.memory_space<vmem>>, vector<1x4x72xbf16>
    %30 = vector.shape_cast %29 : vector<1x4x72xbf16> to vector<4x72xbf16>
    %c5 = arith.constant 5 : index
    %c0_30 = arith.constant 0 : index
    %c0_31 = arith.constant 0 : index
    %31 = vector.load %arg5[%c5, %c0_30, %c0_31] : memref<9x16x4xbf16, #tpu.memory_space<vmem>>, vector<1x16x4xbf16>
    %32 = vector.shape_cast %31 : vector<1x16x4xbf16> to vector<16x4xbf16>
    %cst_32 = arith.constant dense<0.000000e+00> : vector<16x72xf32>
    %33 = tpu.matmul %32, %30, %cst_32 {dimension_numbers = #tpu.dot_dimension_numbers<[1], [0], [0], [1], [0, 0, 1, 1], [], []>} : vector<16x4xbf16>, vector<4x72xbf16>, vector<16x72xf32> -> vector<16x72xf32>
    %34 = arith.addf %28, %33 : vector<16x72xf32>
    %c0_33 = arith.constant 0 : index
    %c0_34 = arith.constant 0 : index
    %c9_35 = arith.constant 9 : index
    %35 = vector.load %arg4[%c0_33, %c0_34, %c9_35] : memref<1x4x128xbf16, #tpu.memory_space<vmem>>, vector<1x4x72xbf16>
    %36 = vector.shape_cast %35 : vector<1x4x72xbf16> to vector<4x72xbf16>
    %c6 = arith.constant 6 : index
    %c0_36 = arith.constant 0 : index
    %c0_37 = arith.constant 0 : index
    %37 = vector.load %arg5[%c6, %c0_36, %c0_37] : memref<9x16x4xbf16, #tpu.memory_space<vmem>>, vector<1x16x4xbf16>
    %38 = vector.shape_cast %37 : vector<1x16x4xbf16> to vector<16x4xbf16>
    %cst_38 = arith.constant dense<0.000000e+00> : vector<16x72xf32>
    %39 = tpu.matmul %38, %36, %cst_38 {dimension_numbers = #tpu.dot_dimension_numbers<[1], [0], [0], [1], [0, 0, 1, 1], [], []>} : vector<16x4xbf16>, vector<4x72xbf16>, vector<16x72xf32> -> vector<16x72xf32>
    %40 = arith.addf %34, %39 : vector<16x72xf32>
    %c0_39 = arith.constant 0 : index
    %c0_40 = arith.constant 0 : index
    %c10_41 = arith.constant 10 : index
    %41 = vector.load %arg3[%c0_39, %c0_40, %c10_41] : memref<1x4x128xbf16, #tpu.memory_space<vmem>>, vector<1x4x72xbf16>
    %42 = vector.shape_cast %41 : vector<1x4x72xbf16> to vector<4x72xbf16>
    %c7 = arith.constant 7 : index
    %c0_42 = arith.constant 0 : index
    %c0_43 = arith.constant 0 : index
    %43 = vector.load %arg5[%c7, %c0_42, %c0_43] : memref<9x16x4xbf16, #tpu.memory_space<vmem>>, vector<1x16x4xbf16>
    %44 = vector.shape_cast %43 : vector<1x16x4xbf16> to vector<16x4xbf16>
    %cst_44 = arith.constant dense<0.000000e+00> : vector<16x72xf32>
    %45 = tpu.matmul %44, %42, %cst_44 {dimension_numbers = #tpu.dot_dimension_numbers<[1], [0], [0], [1], [0, 0, 1, 1], [], []>} : vector<16x4xbf16>, vector<4x72xbf16>, vector<16x72xf32> -> vector<16x72xf32>
    %46 = arith.addf %40, %45 : vector<16x72xf32>
    %c0_45 = arith.constant 0 : index
    %c0_46 = arith.constant 0 : index
    %c10_47 = arith.constant 10 : index
    %47 = vector.load %arg4[%c0_45, %c0_46, %c10_47] : memref<1x4x128xbf16, #tpu.memory_space<vmem>>, vector<1x4x72xbf16>
    %48 = vector.shape_cast %47 : vector<1x4x72xbf16> to vector<4x72xbf16>
    %c8 = arith.constant 8 : index
    %c0_48 = arith.constant 0 : index
    %c0_49 = arith.constant 0 : index
    %49 = vector.load %arg5[%c8, %c0_48, %c0_49] : memref<9x16x4xbf16, #tpu.memory_space<vmem>>, vector<1x16x4xbf16>
    %50 = vector.shape_cast %49 : vector<1x16x4xbf16> to vector<16x4xbf16>
    %cst_50 = arith.constant dense<0.000000e+00> : vector<16x72xf32>
    %51 = tpu.matmul %50, %48, %cst_50 {dimension_numbers = #tpu.dot_dimension_numbers<[1], [0], [0], [1], [0, 0, 1, 1], [], []>} : vector<16x4xbf16>, vector<4x72xbf16>, vector<16x72xf32> -> vector<16x72xf32>
    %52 = arith.addf %46, %51 : vector<16x72xf32>
    %c0_51 = arith.constant 0 : index
    %c0_52 = arith.constant 0 : index
    %53 = vector.load %arg6[%c0_51, %c0_52] : memref<16x1xf32, #tpu.memory_space<vmem>>, vector<16x1xf32>
    %54 = vector.broadcast %53 : vector<16x1xf32> to vector<16x72xf32>
    %55 = arith.addf %52, %54 : vector<16x72xf32>
    %56 = arith.negf %55 : vector<16x72xf32>
    %57 = math.exp %56 : vector<16x72xf32>
    %cst_53 = arith.constant 1.000000e+00 : f32
    %58 = vector.broadcast %cst_53 : f32 to vector<16x72xf32>
    %59 = arith.addf %58, %57 : vector<16x72xf32>
    %60 = arith.divf %58, %59 : vector<16x72xf32>
    %61 = arith.mulf %55, %60 : vector<16x72xf32>
    %62 = arith.truncf %61 : vector<16x72xf32> to vector<16x72xbf16>
    %c0_54 = arith.constant 0 : index
    %c0_55 = arith.constant 0 : index
    %c0_56 = arith.constant 0 : index
    %63 = vector.load %arg9[%c0_54, %c0_55, %c0_56] : memref<1x16x72xbf16, #tpu.memory_space<vmem>>, vector<1x16x72xbf16>
    %64 = vector.shape_cast %63 : vector<1x16x72xbf16> to vector<16x72xbf16>
    %65 = vector.shape_cast %62 : vector<16x72xbf16> to vector<1x16x72xbf16>
    tpu.vector_store %arg9[%c0_54, %c0_55, %c0_56], %65 {strides = array<i32>} : memref<1x16x72xbf16, #tpu.memory_space<vmem>>, vector<1x16x72xbf16>,
    %c0_57 = arith.constant 0 : index
    %c0_58 = arith.constant 0 : index
    %66 = vector.load %arg7[%c0_57, %c0_58] : memref<8x16xbf16, #tpu.memory_space<vmem>>, vector<8x16xbf16>
    %67 = arith.truncf %61 : vector<16x72xf32> to vector<16x72xbf16>
    %cst_59 = arith.constant dense<0.000000e+00> : vector<8x72xf32>
    %68 = tpu.matmul %66, %67, %cst_59 {dimension_numbers = #tpu.dot_dimension_numbers<[1], [0], [0], [1], [0, 0, 1, 1], [], []>} : vector<8x16xbf16>, vector<16x72xbf16>, vector<8x72xf32> -> vector<8x72xf32>
    %c0_60 = arith.constant 0 : index
    %c0_61 = arith.constant 0 : index
    %69 = vector.load %arg8[%c0_60, %c0_61] : memref<8x1xf32, #tpu.memory_space<vmem>>, vector<8x1xf32>
    %70 = vector.broadcast %69 : vector<8x1xf32> to vector<8x72xf32>
    %71 = arith.addf %68, %70 : vector<8x72xf32>
    %72 = arith.negf %71 : vector<8x72xf32>
    %73 = math.exp %72 : vector<8x72xf32>
    %cst_62 = arith.constant 1.000000e+00 : f32
    %74 = vector.broadcast %cst_62 : f32 to vector<8x72xf32>
    %75 = arith.addf %74, %73 : vector<8x72xf32>
    %76 = arith.divf %74, %75 : vector<8x72xf32>
    %77 = arith.mulf %71, %76 : vector<8x72xf32>
    %78 = arith.truncf %77 : vector<8x72xf32> to vector<8x72xbf16>
    %c0_63 = arith.constant 0 : index
    %c0_64 = arith.constant 0 : index
    %c0_65 = arith.constant 0 : index
    %79 = vector.load %arg10[%c0_63, %c0_64, %c0_65] : memref<1x8x72xbf16, #tpu.memory_space<vmem>>, vector<1x8x72xbf16>
    %80 = vector.shape_cast %79 : vector<1x8x72xbf16> to vector<8x72xbf16>
    %81 = vector.shape_cast %78 : vector<8x72xbf16> to vector<1x8x72xbf16>
    tpu.vector_store %arg10[%c0_63, %c0_64, %c0_65], %81 {strides = array<i32>} : memref<1x8x72xbf16, #tpu.memory_space<vmem>>, vector<1x8x72xbf16>,
    return
  }
  func.func @transform_0(%arg0: i32) -> (i32, i32, i32) {
    %c0_i32 = arith.constant 0 : i32
    %c0_i32_0 = arith.constant 0 : i32
    %c0_i32_1 = arith.constant 0 : i32
    return %arg0, %c0_i32, %c0_i32_0 : i32, i32, i32
  }
  func.func @transform_1(%arg0: i32) -> (i32, i32, i32) {
    %c0_i32 = arith.constant 0 : i32
    %c0_i32_0 = arith.constant 0 : i32
    %c0_i32_1 = arith.constant 0 : i32
    return %arg0, %c0_i32, %c0_i32_0 : i32, i32, i32
  }
  func.func @transform_2(%arg0: i32) -> (i32, i32, i32) {
    %c0_i32 = arith.constant 0 : i32
    %c0_i32_0 = arith.constant 0 : i32
    %c0_i32_1 = arith.constant 0 : i32
    return %arg0, %c0_i32, %c0_i32_0 : i32, i32, i32
  }
  func.func @transform_3(%arg0: i32) -> (i32, i32, i32) {
    %c0_i32 = arith.constant 0 : i32
    %c0_i32_0 = arith.constant 0 : i32
    %c0_i32_1 = arith.constant 0 : i32
    return %arg0, %c0_i32, %c0_i32_0 : i32, i32, i32
  }
  func.func @transform_4(%arg0: i32) -> (i32, i32, i32) {
    %c0_i32 = arith.constant 0 : i32
    %c0_i32_0 = arith.constant 0 : i32
    %c0_i32_1 = arith.constant 0 : i32
    %c0_i32_2 = arith.constant 0 : i32
    return %c0_i32, %c0_i32_0, %c0_i32_1 : i32, i32, i32
  }
  func.func @transform_5(%arg0: i32) -> (i32, i32) {
    %c0_i32 = arith.constant 0 : i32
    %c0_i32_0 = arith.constant 0 : i32
    %c0_i32_1 = arith.constant 0 : i32
    return %c0_i32, %c0_i32_0 : i32, i32
  }
  func.func @transform_6(%arg0: i32) -> (i32, i32) {
    %c0_i32 = arith.constant 0 : i32
    %c0_i32_0 = arith.constant 0 : i32
    %c0_i32_1 = arith.constant 0 : i32
    return %c0_i32, %c0_i32_0 : i32, i32
  }
  func.func @transform_7(%arg0: i32) -> (i32, i32) {
    %c0_i32 = arith.constant 0 : i32
    %c0_i32_0 = arith.constant 0 : i32
    %c0_i32_1 = arith.constant 0 : i32
    return %c0_i32, %c0_i32_0 : i32, i32
  }
  func.func @transform_8(%arg0: i32) -> (i32, i32, i32) {
    %c0_i32 = arith.constant 0 : i32
    %c0_i32_0 = arith.constant 0 : i32
    %c0_i32_1 = arith.constant 0 : i32
    return %arg0, %c0_i32, %c0_i32_0 : i32, i32, i32
  }
  func.func @transform_9(%arg0: i32) -> (i32, i32, i32) {
    %c0_i32 = arith.constant 0 : i32
    %c0_i32_0 = arith.constant 0 : i32
    %c0_i32_1 = arith.constant 0 : i32
    return %arg0, %c0_i32, %c0_i32_0 : i32, i32, i32
  }
}

module attributes {stable_mosaic.version = 11 : i64} {
  func.func @kernel(%arg0: i32, %arg1: memref<1x8x128xbf16, #tpu.memory_space<vmem>>, %arg2: memref<1x8x128xbf16, #tpu.memory_space<vmem>>, %arg3: memref<1x8x128xbf16, #tpu.memory_space<vmem>>, %arg4: memref<1x8x128xbf16, #tpu.memory_space<vmem>>, %arg5: memref<9x16x8xbf16, #tpu.memory_space<vmem>>, %arg6: memref<16x1xf32, #tpu.memory_space<vmem>>, %arg7: memref<1x16x20xbf16, #tpu.memory_space<vmem>>) attributes {dimension_semantics = [#tpu.dimension_semantics<parallel>], iteration_bounds = array<i64: 2>, scalar_prefetch = 0 : i64, scratch_operands = 0 : i64, tpu.core_type = #tpu.core_type<tc>, window_params = [{transform_indices = @transform_0, window_bounds = array<i64: 1, 8, 128>}, {transform_indices = @transform_1, window_bounds = array<i64: 1, 8, 128>}, {transform_indices = @transform_2, window_bounds = array<i64: 1, 8, 128>}, {transform_indices = @transform_3, window_bounds = array<i64: 1, 8, 128>}, {pipeline_mode = #tpu.pipeline_mode<synchronous>, transform_indices = @transform_4, window_bounds = array<i64: 9, 16, 8>}, {pipeline_mode = #tpu.pipeline_mode<synchronous>, transform_indices = @transform_5, window_bounds = array<i64: 16, 1>}, {transform_indices = @transform_6, window_bounds = array<i64: 1, 16, 20>}]} {
    %c0 = arith.constant 0 : index
    %c0_0 = arith.constant 0 : index
    %c0_1 = arith.constant 0 : index
    %0 = vector.load %arg4[%c0, %c0_0, %c0_1] : memref<1x8x128xbf16, #tpu.memory_space<vmem>>, vector<1x8x20xbf16>
    %1 = vector.shape_cast %0 : vector<1x8x20xbf16> to vector<8x20xbf16>
    %c0_2 = arith.constant 0 : index
    %c0_3 = arith.constant 0 : index
    %c0_4 = arith.constant 0 : index
    %2 = vector.load %arg5[%c0_2, %c0_3, %c0_4] : memref<9x16x8xbf16, #tpu.memory_space<vmem>>, vector<1x16x8xbf16>
    %3 = vector.shape_cast %2 : vector<1x16x8xbf16> to vector<16x8xbf16>
    %cst = arith.constant dense<0.000000e+00> : vector<16x20xf32>
    %4 = tpu.matmul %3, %1, %cst {dimension_numbers = #tpu.dot_dimension_numbers<[1], [0], [0], [1], [0, 0, 1, 1], [], []>} : vector<16x8xbf16>, vector<8x20xbf16>, vector<16x20xf32> -> vector<16x20xf32>
    %c0_5 = arith.constant 0 : index
    %c0_6 = arith.constant 0 : index
    %c1 = arith.constant 1 : index
    %5 = vector.load %arg3[%c0_5, %c0_6, %c1] : memref<1x8x128xbf16, #tpu.memory_space<vmem>>, vector<1x8x20xbf16>
    %6 = vector.shape_cast %5 : vector<1x8x20xbf16> to vector<8x20xbf16>
    %c1_7 = arith.constant 1 : index
    %c0_8 = arith.constant 0 : index
    %c0_9 = arith.constant 0 : index
    %7 = vector.load %arg5[%c1_7, %c0_8, %c0_9] : memref<9x16x8xbf16, #tpu.memory_space<vmem>>, vector<1x16x8xbf16>
    %8 = vector.shape_cast %7 : vector<1x16x8xbf16> to vector<16x8xbf16>
    %cst_10 = arith.constant dense<0.000000e+00> : vector<16x20xf32>
    %9 = tpu.matmul %8, %6, %cst_10 {dimension_numbers = #tpu.dot_dimension_numbers<[1], [0], [0], [1], [0, 0, 1, 1], [], []>} : vector<16x8xbf16>, vector<8x20xbf16>, vector<16x20xf32> -> vector<16x20xf32>
    %10 = arith.addf %4, %9 : vector<16x20xf32>
    %c0_11 = arith.constant 0 : index
    %c0_12 = arith.constant 0 : index
    %c1_13 = arith.constant 1 : index
    %11 = vector.load %arg4[%c0_11, %c0_12, %c1_13] : memref<1x8x128xbf16, #tpu.memory_space<vmem>>, vector<1x8x20xbf16>
    %12 = vector.shape_cast %11 : vector<1x8x20xbf16> to vector<8x20xbf16>
    %c2 = arith.constant 2 : index
    %c0_14 = arith.constant 0 : index
    %c0_15 = arith.constant 0 : index
    %13 = vector.load %arg5[%c2, %c0_14, %c0_15] : memref<9x16x8xbf16, #tpu.memory_space<vmem>>, vector<1x16x8xbf16>
    %14 = vector.shape_cast %13 : vector<1x16x8xbf16> to vector<16x8xbf16>
    %cst_16 = arith.constant dense<0.000000e+00> : vector<16x20xf32>
    %15 = tpu.matmul %14, %12, %cst_16 {dimension_numbers = #tpu.dot_dimension_numbers<[1], [0], [0], [1], [0, 0, 1, 1], [], []>} : vector<16x8xbf16>, vector<8x20xbf16>, vector<16x20xf32> -> vector<16x20xf32>
    %16 = arith.addf %10, %15 : vector<16x20xf32>
    %c0_17 = arith.constant 0 : index
    %c0_18 = arith.constant 0 : index
    %c5 = arith.constant 5 : index
    %17 = vector.load %arg2[%c0_17, %c0_18, %c5] : memref<1x8x128xbf16, #tpu.memory_space<vmem>>, vector<1x8x20xbf16>
    %18 = vector.shape_cast %17 : vector<1x8x20xbf16> to vector<8x20xbf16>
    %c3 = arith.constant 3 : index
    %c0_19 = arith.constant 0 : index
    %c0_20 = arith.constant 0 : index
    %19 = vector.load %arg5[%c3, %c0_19, %c0_20] : memref<9x16x8xbf16, #tpu.memory_space<vmem>>, vector<1x16x8xbf16>
    %20 = vector.shape_cast %19 : vector<1x16x8xbf16> to vector<16x8xbf16>
    %cst_21 = arith.constant dense<0.000000e+00> : vector<16x20xf32>
    %21 = tpu.matmul %20, %18, %cst_21 {dimension_numbers = #tpu.dot_dimension_numbers<[1], [0], [0], [1], [0, 0, 1, 1], [], []>} : vector<16x8xbf16>, vector<8x20xbf16>, vector<16x20xf32> -> vector<16x20xf32>
    %22 = arith.addf %16, %21 : vector<16x20xf32>
    %c0_22 = arith.constant 0 : index
    %c0_23 = arith.constant 0 : index
    %c6 = arith.constant 6 : index
    %23 = vector.load %arg1[%c0_22, %c0_23, %c6] : memref<1x8x128xbf16, #tpu.memory_space<vmem>>, vector<1x8x20xbf16>
    %24 = vector.shape_cast %23 : vector<1x8x20xbf16> to vector<8x20xbf16>
    %c4 = arith.constant 4 : index
    %c0_24 = arith.constant 0 : index
    %c0_25 = arith.constant 0 : index
    %25 = vector.load %arg5[%c4, %c0_24, %c0_25] : memref<9x16x8xbf16, #tpu.memory_space<vmem>>, vector<1x16x8xbf16>
    %26 = vector.shape_cast %25 : vector<1x16x8xbf16> to vector<16x8xbf16>
    %cst_26 = arith.constant dense<0.000000e+00> : vector<16x20xf32>
    %27 = tpu.matmul %26, %24, %cst_26 {dimension_numbers = #tpu.dot_dimension_numbers<[1], [0], [0], [1], [0, 0, 1, 1], [], []>} : vector<16x8xbf16>, vector<8x20xbf16>, vector<16x20xf32> -> vector<16x20xf32>
    %28 = arith.addf %22, %27 : vector<16x20xf32>
    %c0_27 = arith.constant 0 : index
    %c0_28 = arith.constant 0 : index
    %c6_29 = arith.constant 6 : index
    %29 = vector.load %arg2[%c0_27, %c0_28, %c6_29] : memref<1x8x128xbf16, #tpu.memory_space<vmem>>, vector<1x8x20xbf16>
    %30 = vector.shape_cast %29 : vector<1x8x20xbf16> to vector<8x20xbf16>
    %c5_30 = arith.constant 5 : index
    %c0_31 = arith.constant 0 : index
    %c0_32 = arith.constant 0 : index
    %31 = vector.load %arg5[%c5_30, %c0_31, %c0_32] : memref<9x16x8xbf16, #tpu.memory_space<vmem>>, vector<1x16x8xbf16>
    %32 = vector.shape_cast %31 : vector<1x16x8xbf16> to vector<16x8xbf16>
    %cst_33 = arith.constant dense<0.000000e+00> : vector<16x20xf32>
    %33 = tpu.matmul %32, %30, %cst_33 {dimension_numbers = #tpu.dot_dimension_numbers<[1], [0], [0], [1], [0, 0, 1, 1], [], []>} : vector<16x8xbf16>, vector<8x20xbf16>, vector<16x20xf32> -> vector<16x20xf32>
    %34 = arith.addf %28, %33 : vector<16x20xf32>
    %c0_34 = arith.constant 0 : index
    %c0_35 = arith.constant 0 : index
    %c5_36 = arith.constant 5 : index
    %35 = vector.load %arg4[%c0_34, %c0_35, %c5_36] : memref<1x8x128xbf16, #tpu.memory_space<vmem>>, vector<1x8x20xbf16>
    %36 = vector.shape_cast %35 : vector<1x8x20xbf16> to vector<8x20xbf16>
    %c6_37 = arith.constant 6 : index
    %c0_38 = arith.constant 0 : index
    %c0_39 = arith.constant 0 : index
    %37 = vector.load %arg5[%c6_37, %c0_38, %c0_39] : memref<9x16x8xbf16, #tpu.memory_space<vmem>>, vector<1x16x8xbf16>
    %38 = vector.shape_cast %37 : vector<1x16x8xbf16> to vector<16x8xbf16>
    %cst_40 = arith.constant dense<0.000000e+00> : vector<16x20xf32>
    %39 = tpu.matmul %38, %36, %cst_40 {dimension_numbers = #tpu.dot_dimension_numbers<[1], [0], [0], [1], [0, 0, 1, 1], [], []>} : vector<16x8xbf16>, vector<8x20xbf16>, vector<16x20xf32> -> vector<16x20xf32>
    %40 = arith.addf %34, %39 : vector<16x20xf32>
    %c0_41 = arith.constant 0 : index
    %c0_42 = arith.constant 0 : index
    %c6_43 = arith.constant 6 : index
    %41 = vector.load %arg3[%c0_41, %c0_42, %c6_43] : memref<1x8x128xbf16, #tpu.memory_space<vmem>>, vector<1x8x20xbf16>
    %42 = vector.shape_cast %41 : vector<1x8x20xbf16> to vector<8x20xbf16>
    %c7 = arith.constant 7 : index
    %c0_44 = arith.constant 0 : index
    %c0_45 = arith.constant 0 : index
    %43 = vector.load %arg5[%c7, %c0_44, %c0_45] : memref<9x16x8xbf16, #tpu.memory_space<vmem>>, vector<1x16x8xbf16>
    %44 = vector.shape_cast %43 : vector<1x16x8xbf16> to vector<16x8xbf16>
    %cst_46 = arith.constant dense<0.000000e+00> : vector<16x20xf32>
    %45 = tpu.matmul %44, %42, %cst_46 {dimension_numbers = #tpu.dot_dimension_numbers<[1], [0], [0], [1], [0, 0, 1, 1], [], []>} : vector<16x8xbf16>, vector<8x20xbf16>, vector<16x20xf32> -> vector<16x20xf32>
    %46 = arith.addf %40, %45 : vector<16x20xf32>
    %c0_47 = arith.constant 0 : index
    %c0_48 = arith.constant 0 : index
    %c6_49 = arith.constant 6 : index
    %47 = vector.load %arg4[%c0_47, %c0_48, %c6_49] : memref<1x8x128xbf16, #tpu.memory_space<vmem>>, vector<1x8x20xbf16>
    %48 = vector.shape_cast %47 : vector<1x8x20xbf16> to vector<8x20xbf16>
    %c8 = arith.constant 8 : index
    %c0_50 = arith.constant 0 : index
    %c0_51 = arith.constant 0 : index
    %49 = vector.load %arg5[%c8, %c0_50, %c0_51] : memref<9x16x8xbf16, #tpu.memory_space<vmem>>, vector<1x16x8xbf16>
    %50 = vector.shape_cast %49 : vector<1x16x8xbf16> to vector<16x8xbf16>
    %cst_52 = arith.constant dense<0.000000e+00> : vector<16x20xf32>
    %51 = tpu.matmul %50, %48, %cst_52 {dimension_numbers = #tpu.dot_dimension_numbers<[1], [0], [0], [1], [0, 0, 1, 1], [], []>} : vector<16x8xbf16>, vector<8x20xbf16>, vector<16x20xf32> -> vector<16x20xf32>
    %52 = arith.addf %46, %51 : vector<16x20xf32>
    %c0_53 = arith.constant 0 : index
    %c0_54 = arith.constant 0 : index
    %53 = vector.load %arg6[%c0_53, %c0_54] : memref<16x1xf32, #tpu.memory_space<vmem>>, vector<16x1xf32>
    %54 = vector.broadcast %53 : vector<16x1xf32> to vector<16x20xf32>
    %55 = arith.addf %52, %54 : vector<16x20xf32>
    %56 = arith.negf %55 : vector<16x20xf32>
    %57 = math.exp %56 : vector<16x20xf32>
    %cst_55 = arith.constant 1.000000e+00 : f32
    %58 = vector.broadcast %cst_55 : f32 to vector<16x20xf32>
    %59 = arith.addf %58, %57 : vector<16x20xf32>
    %60 = arith.divf %58, %59 : vector<16x20xf32>
    %61 = arith.mulf %55, %60 : vector<16x20xf32>
    %62 = arith.truncf %61 : vector<16x20xf32> to vector<16x20xbf16>
    %c0_56 = arith.constant 0 : index
    %c0_57 = arith.constant 0 : index
    %c0_58 = arith.constant 0 : index
    %63 = vector.load %arg7[%c0_56, %c0_57, %c0_58] : memref<1x16x20xbf16, #tpu.memory_space<vmem>>, vector<1x16x20xbf16>
    %64 = vector.shape_cast %63 : vector<1x16x20xbf16> to vector<16x20xbf16>
    %65 = vector.shape_cast %62 : vector<16x20xbf16> to vector<1x16x20xbf16>
    tpu.vector_store %arg7[%c0_56, %c0_57, %c0_58], %65 {strides = array<i32>} : memref<1x16x20xbf16, #tpu.memory_space<vmem>>, vector<1x16x20xbf16>,
    return
  }
  func.func @transform_0(%arg0: i32) -> (i32, i32, i32) {
    %c0_i32 = arith.constant 0 : i32
    %c0_i32_0 = arith.constant 0 : i32
    %c0_i32_1 = arith.constant 0 : i32
    return %arg0, %c0_i32, %c0_i32_0 : i32, i32, i32
  }
  func.func @transform_1(%arg0: i32) -> (i32, i32, i32) {
    %c0_i32 = arith.constant 0 : i32
    %c0_i32_0 = arith.constant 0 : i32
    %c0_i32_1 = arith.constant 0 : i32
    return %arg0, %c0_i32, %c0_i32_0 : i32, i32, i32
  }
  func.func @transform_2(%arg0: i32) -> (i32, i32, i32) {
    %c0_i32 = arith.constant 0 : i32
    %c0_i32_0 = arith.constant 0 : i32
    %c0_i32_1 = arith.constant 0 : i32
    return %arg0, %c0_i32, %c0_i32_0 : i32, i32, i32
  }
  func.func @transform_3(%arg0: i32) -> (i32, i32, i32) {
    %c0_i32 = arith.constant 0 : i32
    %c0_i32_0 = arith.constant 0 : i32
    %c0_i32_1 = arith.constant 0 : i32
    return %arg0, %c0_i32, %c0_i32_0 : i32, i32, i32
  }
  func.func @transform_4(%arg0: i32) -> (i32, i32, i32) {
    %c0_i32 = arith.constant 0 : i32
    %c0_i32_0 = arith.constant 0 : i32
    %c0_i32_1 = arith.constant 0 : i32
    %c0_i32_2 = arith.constant 0 : i32
    return %c0_i32, %c0_i32_0, %c0_i32_1 : i32, i32, i32
  }
  func.func @transform_5(%arg0: i32) -> (i32, i32) {
    %c0_i32 = arith.constant 0 : i32
    %c0_i32_0 = arith.constant 0 : i32
    %c0_i32_1 = arith.constant 0 : i32
    return %c0_i32, %c0_i32_0 : i32, i32
  }
  func.func @transform_6(%arg0: i32) -> (i32, i32, i32) {
    %c0_i32 = arith.constant 0 : i32
    %c0_i32_0 = arith.constant 0 : i32
    %c0_i32_1 = arith.constant 0 : i32
    return %arg0, %c0_i32, %c0_i32_0 : i32, i32, i32
  }
}

module attributes {stable_mosaic.version = 11 : i64} {
  func.func @_pw2_kernel(%arg0: i32, %arg1: i32, %arg2: memref<1x16x128xbf16, #tpu.memory_space<vmem>>, %arg3: memref<1x16x128xbf16, #tpu.memory_space<vmem>>, %arg4: memref<16x16xbf16, #tpu.memory_space<vmem>>, %arg5: memref<16x16xbf16, #tpu.memory_space<vmem>>, %arg6: memref<16x1xf32, #tpu.memory_space<vmem>>, %arg7: memref<1x16x128xf32, #tpu.memory_space<vmem>>) attributes {dimension_semantics = [#tpu.dimension_semantics<parallel>, #tpu.dimension_semantics<parallel>], iteration_bounds = array<i64: 2, 1>, scalar_prefetch = 0 : i64, scratch_operands = 0 : i64, tpu.core_type = #tpu.core_type<tc>, window_params = [{transform_indices = @transform_0, window_bounds = array<i64: 1, 16, 128>}, {transform_indices = @transform_1, window_bounds = array<i64: 1, 16, 128>}, {pipeline_mode = #tpu.pipeline_mode<synchronous>, transform_indices = @transform_2, window_bounds = array<i64: 16, 16>}, {pipeline_mode = #tpu.pipeline_mode<synchronous>, transform_indices = @transform_3, window_bounds = array<i64: 16, 16>}, {pipeline_mode = #tpu.pipeline_mode<synchronous>, transform_indices = @transform_4, window_bounds = array<i64: 16, 1>}, {transform_indices = @transform_5, window_bounds = array<i64: 1, 16, 128>}]} {
    %c0 = arith.constant 0 : index
    %c0_0 = arith.constant 0 : index
    %0 = vector.load %arg4[%c0, %c0_0] : memref<16x16xbf16, #tpu.memory_space<vmem>>, vector<16x16xbf16>
    %c0_1 = arith.constant 0 : index
    %c0_2 = arith.constant 0 : index
    %c0_3 = arith.constant 0 : index
    %1 = vector.load %arg2[%c0_1, %c0_2, %c0_3] : memref<1x16x128xbf16, #tpu.memory_space<vmem>>, vector<1x16x128xbf16>
    %2 = vector.shape_cast %1 : vector<1x16x128xbf16> to vector<16x128xbf16>
    %cst = arith.constant dense<0.000000e+00> : vector<16x128xf32>
    %3 = tpu.matmul %0, %2, %cst {dimension_numbers = #tpu.dot_dimension_numbers<[1], [0], [0], [1], [0, 0, 1, 1], [], []>} : vector<16x16xbf16>, vector<16x128xbf16>, vector<16x128xf32> -> vector<16x128xf32>
    %c0_4 = arith.constant 0 : index
    %c0_5 = arith.constant 0 : index
    %4 = vector.load %arg5[%c0_4, %c0_5] : memref<16x16xbf16, #tpu.memory_space<vmem>>, vector<16x16xbf16>
    %c0_6 = arith.constant 0 : index
    %c0_7 = arith.constant 0 : index
    %c0_8 = arith.constant 0 : index
    %5 = vector.load %arg3[%c0_6, %c0_7, %c0_8] : memref<1x16x128xbf16, #tpu.memory_space<vmem>>, vector<1x16x128xbf16>
    %6 = vector.shape_cast %5 : vector<1x16x128xbf16> to vector<16x128xbf16>
    %cst_9 = arith.constant dense<0.000000e+00> : vector<16x128xf32>
    %7 = tpu.matmul %4, %6, %cst_9 {dimension_numbers = #tpu.dot_dimension_numbers<[1], [0], [0], [1], [0, 0, 1, 1], [], []>} : vector<16x16xbf16>, vector<16x128xbf16>, vector<16x128xf32> -> vector<16x128xf32>
    %8 = arith.addf %3, %7 : vector<16x128xf32>
    %c0_10 = arith.constant 0 : index
    %c0_11 = arith.constant 0 : index
    %9 = vector.load %arg6[%c0_10, %c0_11] : memref<16x1xf32, #tpu.memory_space<vmem>>, vector<16x1xf32>
    %10 = vector.broadcast %9 : vector<16x1xf32> to vector<16x128xf32>
    %11 = arith.addf %8, %10 : vector<16x128xf32>
    %12 = arith.negf %11 : vector<16x128xf32>
    %13 = math.exp %12 : vector<16x128xf32>
    %cst_12 = arith.constant 1.000000e+00 : f32
    %14 = vector.broadcast %cst_12 : f32 to vector<16x128xf32>
    %15 = arith.addf %14, %13 : vector<16x128xf32>
    %16 = arith.divf %14, %15 : vector<16x128xf32>
    %17 = arith.mulf %11, %16 : vector<16x128xf32>
    %c0_13 = arith.constant 0 : index
    %c0_14 = arith.constant 0 : index
    %c0_15 = arith.constant 0 : index
    %18 = vector.load %arg7[%c0_13, %c0_14, %c0_15] : memref<1x16x128xf32, #tpu.memory_space<vmem>>, vector<1x16x128xf32>
    %19 = vector.shape_cast %18 : vector<1x16x128xf32> to vector<16x128xf32>
    %20 = vector.shape_cast %17 : vector<16x128xf32> to vector<1x16x128xf32>
    tpu.vector_store %arg7[%c0_13, %c0_14, %c0_15], %20 {strides = array<i32>} : memref<1x16x128xf32, #tpu.memory_space<vmem>>, vector<1x16x128xf32>,
    return
  }
  func.func @transform_0(%arg0: i32, %arg1: i32) -> (i32, i32, i32) {
    %c0_i32 = arith.constant 0 : i32
    %c0_i32_0 = arith.constant 0 : i32
    return %arg0, %c0_i32, %arg1 : i32, i32, i32
  }
  func.func @transform_1(%arg0: i32, %arg1: i32) -> (i32, i32, i32) {
    %c0_i32 = arith.constant 0 : i32
    %c0_i32_0 = arith.constant 0 : i32
    return %arg0, %c0_i32, %arg1 : i32, i32, i32
  }
  func.func @transform_2(%arg0: i32, %arg1: i32) -> (i32, i32) {
    %c0_i32 = arith.constant 0 : i32
    %c0_i32_0 = arith.constant 0 : i32
    %c0_i32_1 = arith.constant 0 : i32
    return %c0_i32, %c0_i32_0 : i32, i32
  }
  func.func @transform_3(%arg0: i32, %arg1: i32) -> (i32, i32) {
    %c0_i32 = arith.constant 0 : i32
    %c0_i32_0 = arith.constant 0 : i32
    %c0_i32_1 = arith.constant 0 : i32
    return %c0_i32, %c0_i32_0 : i32, i32
  }
  func.func @transform_4(%arg0: i32, %arg1: i32) -> (i32, i32) {
    %c0_i32 = arith.constant 0 : i32
    %c0_i32_0 = arith.constant 0 : i32
    %c0_i32_1 = arith.constant 0 : i32
    return %c0_i32, %c0_i32_0 : i32, i32
  }
  func.func @transform_5(%arg0: i32, %arg1: i32) -> (i32, i32, i32) {
    %c0_i32 = arith.constant 0 : i32
    %c0_i32_0 = arith.constant 0 : i32
    return %arg0, %c0_i32, %arg1 : i32, i32, i32
  }
}

</mosaic_0001>

<bundles_post_ra>
// kernel: stem_block_forward.4
= control target key start
LH: loop header
LB: loop body
LE: loop exit
PB: predicated region body
PF: predicated region fallthrough
CT: control target
= control target key end

     0   :  { %s1189_s21 = smov 0   ;;  %s1297_s0 = inlined_call_operand.vmem [shape: bf16[2,8,128], index: 0, kind: input, shape index: {}]   ;;  %s1298_s1 = inlined_call_operand.vmem [shape: bf16[2,8,128], index: 1, kind: input, shape index: {}]   ;;  %s1299_s2 = inlined_call_operand.vmem [shape: bf16[2,8,128], index: 2, kind: input, shape index: {}]   ;;  %s1300_s3 = inlined_call_operand.vmem [shape: bf16[2,8,128], index: 3, kind: input, shape index: {}]   ;;  %s1301_s4 = inlined_call_operand.vmem [shape: bf16[9,16,8], index: 4, kind: input, shape index: {}]   ;;  %s1302_s5 = inlined_call_operand.vmem [shape: f32[16,1], index: 5, kind: input, shape index: {}]   ;;  %s1303_s6 = inlined_call_operand.vmem [shape: bf16[2,16,20], index: 6, kind: output, shape index: {}]  }
   0x1 LB: > { %s973_s22 = sadd.s32 4294967295, %s1146_s21   ;;  %p977_p0 = scmp.ge.s32.totalorder %s1146_s21, 1  ;;  %s1146_s21 = sphi %s1189_s21, %s16_s21  }
   0x2   : > { %p238_p1 = scmp.lt.s32.totalorder %s1146_s21, 3 }
   0x4   : > { %p239_p2 = pnand %p977_p0, %p238_p1 }
   0x5   : > { %p279_p3 = scmp.lt.s32.totalorder (!%p239_p2), %s973_s22, 1  ;;  %v1148_v0 = vmov (!%p239_p2), 0.0   ;;  %vm1149_vm0 = vmmov (!%p239_p2), 0   ;;  %vm322_vm1 = vcmask (!%p239_p2), 1043456   ;;  %s1150_s12 = smov (!%p239_p2), 127   ;;  %vm318_vm2 = vcmask (!%p239_p2), 64512  }
   0x6   : > { %242 = sbr.rel (%p239_p2) target bundleno = 417 (0x1a1), region = 44  ;;  %1049 = vmatprep.subr.bf16.mxu0 (!%p239_p2), %v1148_v0  ;;  %1055 = vmatprep.subr.bf16.mxu1 (!%p239_p2), %v1148_v0  ;;  %v1124_v7 = vld [vmem:[%s1301_s4] sm:$0xff] (!%p239_p2)   ;;  %s1151_s15 = smov (!%p239_p2), 123   ;;  %v844_v9 = vld [vmem:[%s1302_s5 + $0x8] sm:$0xff] (!%p239_p2)  ;;  %v1153_v10 = vmov (!%p239_p2), 0   ;;  %v1126_v16 = vld [vmem:[%s1301_s4 + $0x18] sm:$0xff] (!%p239_p2)  }
   0x7   : > { %1051 = vmatprep.mubr.msk.bf16.mxu0 (!%p239_p2), %vm1149_vm0, %v1148_v0  ;;  %1057 = vmatprep.mubr.msk.bf16.mxu1 (!%p239_p2), %vm1149_vm0, %v1148_v0  ;;  %s1152_s16 = smov (!%p239_p2), 122   ;;  %v843_v8 = vld [vmem:[%s1302_s5] sm:$0xff] (!%p239_p2)  ;;  %v1123_v13 = vld [vmem:[%s1301_s4 + $0x8] sm:$0xff] (!%p239_p2)   ;;  %v1125_v21 = vld [vmem:[%s1301_s4 + $0x10] sm:$0xff] (!%p239_p2)   ;;  %vm879_vm3 = vcmask (!%p239_p2), 158720  }
   0x8   : > { %1117 = vset.pattern.permute.xlu0 (!%p239_p2), %v1153_v10  ;;  %1118 = vset.pattern.permute.xlu1 (!%p239_p2), %v1153_v10  ;;  %v1128_v24 = vld [vmem:[%s1301_s4 + $0x28] sm:$0xff] (!%p239_p2)   ;;  %v1127_v28 = vld [vmem:[%s1301_s4 + $0x20] sm:$0xff] (!%p239_p2)   ;;  %v1130_v30 = vld [vmem:[%s1301_s4 + $0x38] sm:$0xff] (!%p239_p2)  }
   0x9   : > { %v1129_v32 = vld [vmem:[%s1301_s4 + $0x30] sm:$0xff] (!%p239_p2)   ;;  %v1131_v34 = vld [vmem:[%s1301_s4 + $0x40] sm:$0xff] (!%p239_p2)  }
   0xd   : > { %s1305_s22 = smov (!%p279_p3, %s973_s22), 1 }
   0xe   : > { %s978_s23 = sshll.u32 %s1305_s22, 2 }
   0xf   : > { %s290_s26 = scalar_lea.vmem %s1299_s2, %s978_s23  ;;  %s294_s29 = scalar_lea.vmem %s1300_s3, %s978_s23 }
  0x10   : > { %v1119_v1 = vld [vmem:[%s290_s26] ss:$0 sps:$4 sm:$0xff]   ;;  %s286_s8 = scalar_lea.vmem %s1298_s1, %s978_s23  ;;  %s282_s11 = scalar_lea.vmem %s1297_s0, %s978_s23 }
  0x11   : > { %v301_v2 = vld [vmem:[%s294_s29] sm:$0xf]  ;;  %316 = vrot.lane.b32.xlu0 %v1119_v1, %s1150_s12 }
  0x12   : > { %v1121_v3 = vld [vmem:[%s286_s8] ss:$0 sps:$4 sm:$0xff]   ;;  %v994_v4 = vcombine.low %v301_v2, %v301_v2  ;;  %v376_v6 = vsel %vm322_vm1, %v301_v2, 0 }
  0x13   : > { %v1122_v5 = vld [vmem:[%s282_s11] ss:$0 sps:$4 sm:$0xff]   ;;  %493 = vrot.lane.b32.xlu1 %v1121_v3, %s1151_s15  ;;  %1056 = vmatpush3.bf16.msra.mxu1 %v376_v6 }
  0x14   : > { %1067 = vmatprep.subr.bf16.mxu1 %v1148_v0 }
  0x15   : > { %430 = vrot.lane.b32.xlu0 %v994_v4, %s1150_s12 }
  0x16   : > { %1058 = vmatmul.mubr.msk.bf16.vlgmr.msra.gmra.mrb[0].mxu1 %vm318_vm2, %v1124_v7 }
  0x17   : > { %556 = vrot.lane.b32.xlu1 %v1122_v5, %s1152_s16  ;;  %1069 = vmatprep.mubr.msk.bf16.mxu1 %vm1149_vm0, %v1148_v0 }
  0x19   : > { %615 = vrot.lane.b32.xlu0 %v1121_v3, %s1152_s16 }
  0x1b   : > { %674 = vrot.lane.b32.xlu1 %v994_v4, %s1151_s15  ;;  %s1028_s15 = sshll.u32 %s1305_s22, 3 }
  0x1c   : > { %s299_s18 = scalar_lea.vmem %s1303_s6, %s1028_s15 }
  0x1d   : > { %733 = vrot.lane.b32.xlu0 %v1119_v1, %s1152_s16 }
  0x1f   : > { %792 = vrot.lane.b32.xlu1 %v994_v4, %s1152_s16 }
  0x21   : > { %847 = vperm.xlu0 %1117, %v843_v8  }
  0x23   : > { %852 = vperm.xlu1 %1118, %v844_v9  }
  0x83   : > { %v317_v11 = vpop.permute.xlu0 %316 }
  0x84   : > { %v324_v12 = vsel %vm322_vm1, %v317_v11, 0 }
  0x85   : > { %v494_v14 = vpop.permute.xlu1 %493  ;;  %1050 = vmatpush3.bf16.msra.mxu0 %v324_v12 }
  0x86   : > { %v499_v15 = vsel %vm322_vm1, %v494_v14, 0  ;;  %1061 = vmatprep.subr.bf16.mxu0 %v1148_v0 }
  0x87   : > { %1068 = vmatpush3.bf16.msra.mxu1 %v499_v15  ;;  %v431_v17 = vpop.permute.xlu0 %430 }
  0x88   : > { %1079 = vmatprep.subr.bf16.mxu1 %v1148_v0  ;;  %v436_v18 = vsel %vm322_vm1, %v431_v17, 0  ;;  %1052 = vmatmul.mubr.msk.bf16.vlgmr.msra.gmra.mrb[0].mxu0 %vm318_vm2, %v1123_v13 }
  0x89   : > { %1062 = vmatpush3.bf16.msra.mxu0 %v436_v18  ;;  %1063 = vmatprep.mubr.msk.bf16.mxu0 %vm1149_vm0, %v1148_v0  ;;  %v557_v19 = vpop.permute.xlu1 %556 }
  0x8a   : > { %1073 = vmatprep.subr.bf16.mxu0 %v1148_v0  ;;  %1070 = vmatmul.mubr.msk.bf16.vlgmr.msra.gmra.mrb[4].mxu1 %vm318_vm2, %v1126_v16  ;;  %v562_v23 = vsel %vm322_vm1, %v557_v19, 0 }
  0x8b   : > { %v616_v20 = vpop.permute.xlu0 %615  ;;  %1081 = vmatprep.mubr.msk.bf16.mxu1 %vm1149_vm0, %v1148_v0 }
  0x8c   : > { %v621_v22 = vsel %vm322_vm1, %v616_v20, 0 }
  0x8d   : > { %1080 = vmatpush3.bf16.msra.mxu1 %v621_v22  ;;  %v675_v27 = vpop.permute.xlu1 %674 }
  0x8e   : > { %1091 = vmatprep.subr.bf16.mxu1 %v1148_v0  ;;  %v680_v29 = vsel %vm322_vm1, %v675_v27, 0 }
  0x8f   : > { %v734_v25 = vpop.permute.xlu0 %733 }
  0x90   : > { %1064 = vmatmul.mubr.msk.bf16.vlgmr.msra.gmra.mrb[4].mxu0 %vm318_vm2, %v1125_v21  ;;  %v739_v26 = vsel %vm322_vm1, %v734_v25, 0 }
  0x91   : > { %1074 = vmatpush3.bf16.msra.mxu0 %v562_v23  ;;  %1075 = vmatprep.mubr.msk.bf16.mxu0 %vm1149_vm0, %v1148_v0  ;;  %v793_v31 = vpop.permute.xlu1 %792 }
  0x92   : > { %1085 = vmatprep.subr.bf16.mxu0 %v1148_v0  ;;  %1082 = vmatmul.mubr.msk.bf16.vlgmr.msra.gmra.mrb[8].mxu1 %vm318_vm2, %v1128_v24  ;;  %v798_v33 = vsel %vm322_vm1, %v793_v31, 0 }
  0x93   : > { %1092 = vmatpush3.bf16.msra.mxu1 %v739_v26  ;;  %1093 = vmatprep.mubr.msk.bf16.mxu1 %vm1149_vm0, %v1148_v0 }
  0x98   : > { %1076 = vmatmul.mubr.msk.bf16.vlgmr.msra.gmra.mrb[8].mxu0 %vm318_vm2, %v1127_v28 }
  0x99   : > { %1086 = vmatpush3.bf16.msra.mxu0 %v680_v29  ;;  %1087 = vmatprep.mubr.msk.bf16.mxu0 %vm1149_vm0, %v1148_v0 }
  0x9a   : > { %1097 = vmatprep.subr.bf16.mxu0 %v1148_v0  ;;  %1094 = vmatmul.mubr.msk.bf16.vlgmr.msra.gmra.mrb[12].mxu1 %vm318_vm2, %v1130_v30 }
  0xa0   : > { %1088 = vmatmul.mubr.msk.bf16.vlgmr.msra.gmra.mrb[12].mxu0 %vm318_vm2, %v1129_v32  ;;  %v848_v18 = vpop.permute.xlu0 %847 }
  0xa1   : > { %1098 = vmatpush3.bf16.msra.mxu0 %v798_v33  ;;  %1099 = vmatprep.mubr.msk.bf16.mxu0 %vm1149_vm0, %v1148_v0 }
  0xa2   : > { %v853_v22 = vpop.permute.xlu1 %852 }
  0xa8   : > { %1100 = vmatmul.mubr.msk.bf16.vlgmr.msra.gmra.mrb[16].mxu0 %vm318_vm2, %v1131_v34 }
  0xe9   : > { %v412_v35 = vpop.f32.mrb[0].mxu1 }
  0xea   : > { %v1059_v36 = vpop.f32.mrb[1].mxu1 }
  0xeb   : > { %v415_v37 = vpop.f32.mrb[2].mxu1 }
  0xec   : > { %v1060_v38 = vpop.f32.mrb[3].mxu1 }
 0x15b   : > { %v360_v39 = vpop.f32.mrb[0].mxu0 }
 0x15c   : > { %v413_v40 = vadd.f32 %v412_v35, %v360_v39  ;;  %v1053_v41 = vpop.f32.mrb[1].mxu0 }
 0x15d   : > { %v363_v42 = vpop.f32.mrb[2].mxu0  ;;  %v535_v43 = vpop.f32.mrb[4].mxu1 }
 0x15e   : > { %v416_v44 = vadd.f32 %v415_v37, %v363_v42  ;;  %v1054_v45 = vpop.f32.mrb[3].mxu0  ;;  %v1071_v46 = vpop.f32.mrb[5].mxu1 }
 0x15f   : > { %v538_v47 = vpop.f32.mrb[6].mxu1 }
 0x160   : > { %v1072_v48 = vpop.f32.mrb[7].mxu1 }
 0x163   : > { %v472_v49 = vpop.f32.mrb[4].mxu0 }
 0x164   : > { %v479_v50 = vadd.f32 %v472_v49, %v413_v40  ;;  %v1065_v51 = vpop.f32.mrb[5].mxu0 }
 0x165   : > { %v475_v52 = vpop.f32.mrb[6].mxu0  ;;  %v657_v53 = vpop.f32.mrb[8].mxu1 }
 0x166   : > { %v480_v54 = vadd.f32 %v475_v52, %v416_v44  ;;  %v542_v55 = vadd.f32 %v535_v43, %v479_v50  ;;  %v1066_v56 = vpop.f32.mrb[7].mxu0  ;;  %v1083_v57 = vpop.f32.mrb[9].mxu1 }
 0x167   : > { %v660_v58 = vpop.f32.mrb[10].mxu1 }
 0x168   : > { %v543_v59 = vadd.f32 %v538_v47, %v480_v54  ;;  %v1084_v60 = vpop.f32.mrb[11].mxu1 }
 0x16b   : > { %v598_v61 = vpop.f32.mrb[8].mxu0 }
 0x16c   : > { %v605_v62 = vadd.f32 %v598_v61, %v542_v55  ;;  %v1077_v63 = vpop.f32.mrb[9].mxu0 }
 0x16d   : > { %v601_v0 = vpop.f32.mrb[10].mxu0  ;;  %v775_v1 = vpop.f32.mrb[12].mxu1 }
 0x16e   : > { %v606_v2 = vadd.f32 %v601_v0, %v543_v59  ;;  %v664_v3 = vadd.f32 %v657_v53, %v605_v62  ;;  %v1078_v4 = vpop.f32.mrb[11].mxu0  ;;  %v1095_v5 = vpop.f32.mrb[13].mxu1 }
 0x16f   : > { %v778_v6 = vpop.f32.mrb[14].mxu1 }
 0x170   : > { %v665_v7 = vadd.f32 %v660_v58, %v606_v2  ;;  %v1096_v8 = vpop.f32.mrb[15].mxu1 }
 0x173   : > { %v716_v9 = vpop.f32.mrb[12].mxu0 }
 0x174   : > { %v723_v10 = vadd.f32 %v716_v9, %v664_v3  ;;  %v1089_v11 = vpop.f32.mrb[13].mxu0 }
 0x175   : > { %v719_v12 = vpop.f32.mrb[14].mxu0 }
 0x176   : > { %v724_v13 = vadd.f32 %v719_v12, %v665_v7  ;;  %v782_v14 = vadd.f32 %v775_v1, %v723_v10  ;;  %v1090_v15 = vpop.f32.mrb[15].mxu0 }
 0x178   : > { %v783_v16 = vadd.f32 %v778_v6, %v724_v13 }
 0x17b   : > { %v834_v17 = vpop.f32.mrb[16].mxu0 }
 0x17c   : > { %v841_v19 = vadd.f32 %v834_v17, %v782_v14  ;;  %v1101_v20 = vpop.f32.mrb[17].mxu0 }
 0x17d   : > { %v837_v21 = vpop.f32.mrb[18].mxu0 }
 0x17e   : > { %v855_v23 = vadd.f32 %v848_v18, %v841_v19  ;;  %v842_v24 = vadd.f32 %v837_v21, %v783_v16  ;;  %v1102_v25 = vpop.f32.mrb[19].mxu0 }
 0x180   : > { %v1022_v26 = vmul.f32 -1.442695, %v855_v23  ;;  %v856_v27 = vadd.f32 %v853_v22, %v842_v24 }
 0x182   : > { %1132 = vpow2.f32 %v1022_v26  ;;  %v1023_v28 = vmul.f32 -1.442695, %v856_v27 }
 0x184   : > { %1134 = vpow2.f32 %v1023_v28 }
 0x18c   : > { %v1133_v29 = vpop.eup %1132 }
 0x18d   : > { %v863_v30 = vadd.f32 1.0, %v1133_v29 }
 0x18e   : > { %v1135_v31 = vpop.eup %1134 }
 0x18f   : > { %1136 = vrcp.f32 %v863_v30  ;;  %v864_v32 = vadd.f32 1.0, %v1135_v31 }
 0x191   : > { %1138 = vrcp.f32 %v864_v32 }
 0x199   : > { %v1137_v33 = vpop.eup %1136 }
 0x19a   : > { %v869_v34 = vmul.f32 %v1137_v33, %v855_v23 }
 0x19b   : > { %v1139_v35 = vpop.eup %1138 }
 0x19c   : > { %v1029_v36 = vpack.c.bf16 %v869_v34, %v869_v34  ;;  %v870_v37 = vmul.f32 %v1139_v35, %v856_v27 }
 0x19e   : > { %880 = vst.msk [vmem:[%s299_s18] sm:$0xf] %vm879_vm3, %v1029_v36  ;;  %v1030_v38 = vpack.c.bf16 %v870_v37, %v870_v37 }
 0x1a0   : > { %881 = vst.msk [vmem:[%s299_s18 + $0x4] sm:$0xf] %vm879_vm3, %v1030_v38 }
 0x1a1 PF: > { %s16_s21 = sadd.s32 1, %s1146_s21  }
 0x1a2   : > { %p13_p4 = scmp.ge.s32.totalorder %s16_s21, 4  }
 0x1a4   :  { %15 = sbr.rel (!%p13_p4) target bundleno = 1 (0x1), region = 91 }

// kernel: stem_block_forward.3
= control target key start
LH: loop header
LB: loop body
LE: loop exit
PB: predicated region body
PF: predicated region fallthrough
CT: control target
= control target key end

     0   :  { %s1459_s30 = smov 0   ;;  %s1583_s0 = inlined_call_operand.vmem [shape: bf16[2,4,128], index: 0, kind: input, shape index: {}]   ;;  %s1584_s1 = inlined_call_operand.vmem [shape: bf16[2,4,128], index: 1, kind: input, shape index: {}]   ;;  %s1585_s2 = inlined_call_operand.vmem [shape: bf16[2,4,128], index: 2, kind: input, shape index: {}]   ;;  %s1586_s3 = inlined_call_operand.vmem [shape: bf16[2,4,128], index: 3, kind: input, shape index: {}]   ;;  %s1587_s4 = inlined_call_operand.vmem [shape: bf16[9,16,4], index: 4, kind: input, shape index: {}]   ;;  %s1588_s5 = inlined_call_operand.vmem [shape: f32[16,1], index: 5, kind: input, shape index: {}]   ;;  %s1589_s6 = inlined_call_operand.vmem [shape: bf16[8,16], index: 6, kind: input, shape index: {}]   ;;  %s1590_s7 = inlined_call_operand.vmem [shape: f32[8,1], index: 7, kind: input, shape index: {}]   ;;  %s1591_s8 = inlined_call_operand.vmem [shape: bf16[2,16,72], index: 8, kind: output, shape index: {0}]   ;;  %s1592_s9 = inlined_call_operand.vmem [shape: bf16[2,8,72], index: 9, kind: output, shape index: {1}]  }
   0x1 LB: > { %s1213_s10 = sadd.s32 4294967295, %s1401_s30   ;;  %p1217_p0 = scmp.ge.s32.totalorder %s1401_s30, 1  ;;  %s1401_s30 = sphi %s1459_s30, %s20_s30  }
   0x2   : > { %p316_p1 = scmp.lt.s32.totalorder %s1401_s30, 3 }
   0x4   : > { %p317_p2 = pnand %p1217_p0, %p316_p1 }
   0x5   : > { %p367_p3 = scmp.lt.s32.totalorder (!%p317_p2), %s1213_s10, 1  ;;  %v1403_v0 = vmov (!%p317_p2), 0.0   ;;  %vm1404_vm0 = vmmov (!%p317_p2), 0   ;;  %vm419_vm1 = vcmask (!%p317_p2), 1041408   ;;  %s1405_s24 = smov (!%p317_p2), 127   ;;  %v1375_v5 = vld [vmem:[%s1587_s4] sm:$0xff] (!%p317_p2)  }
   0x6   : > { %320 = sbr.rel (%p317_p2) target bundleno = 664 (0x298), region = 52  ;;  %1298 = vmatprep.subr.bf16.mxu0 (!%p317_p2), %v1403_v0  ;;  %1304 = vmatprep.subr.bf16.mxu1 (!%p317_p2), %v1403_v0  ;;  %vm415_vm2 = vcmask (!%p317_p2), 31744   ;;  %s1406_s27 = smov (!%p317_p2), 119   ;;  %v993_v8 = vld [vmem:[%s1588_s5 + $0x8] sm:$0xff] (!%p317_p2)  ;;  %v992_v9 = vld [vmem:[%s1588_s5] sm:$0xff] (!%p317_p2)  ;;  %v1408_v10 = vmov (!%p317_p2), 0  }
   0x7   : > { %1300 = vmatprep.mubr.msk.bf16.mxu0 (!%p317_p2), %vm1404_vm0, %v1403_v0  ;;  %1306 = vmatprep.mubr.msk.bf16.mxu1 (!%p317_p2), %vm1404_vm0, %v1403_v0  ;;  %s1407_s28 = smov (!%p317_p2), 118   ;;  %v1032_v11 = vld [vmem:[%s1590_s7] sm:$0xff] (!%p317_p2)  ;;  %v1374_v14 = vld [vmem:[%s1587_s4 + $0x8] sm:$0xff] (!%p317_p2)   ;;  %v1377_v17 = vld [vmem:[%s1587_s4 + $0x18] sm:$0xff] (!%p317_p2)   ;;  %vm1028_vm3 = vcmask (!%p317_p2), 584704   ;;  %vm1038_vm4 = vcmask (!%p317_p2), 130048  }
   0x8   : > { %1373 = vset.pattern.permute.xlu1 (!%p317_p2), %v1408_v10  ;;  %1372 = vset.pattern.permute.xlu0 (!%p317_p2), %v1408_v10  ;;  %v1376_v22 = vld [vmem:[%s1587_s4 + $0x10] sm:$0xff] (!%p317_p2)   ;;  %v1379_v25 = vld [vmem:[%s1587_s4 + $0x28] sm:$0xff] (!%p317_p2)   ;;  %v1378_v29 = vld [vmem:[%s1587_s4 + $0x20] sm:$0xff] (!%p317_p2)  }
   0x9   : > { %v1381_v31 = vld [vmem:[%s1587_s4 + $0x38] sm:$0xff] (!%p317_p2)   ;;  %v1380_v33 = vld [vmem:[%s1587_s4 + $0x30] sm:$0xff] (!%p317_p2)   ;;  %v1382_v35 = vld [vmem:[%s1587_s4 + $0x40] sm:$0xff] (!%p317_p2)  }
   0xd   : > { %s1594_s10 = smov (!%p367_p3, %s1213_s10), 1 }
   0xe   : > { %s1218_s11 = sshll.u32 %s1594_s10, 1  ;;  %s1275_s13 = sshll.u32 %s1594_s10, 3 }
   0xf   : > { %s378_s14 = scalar_lea.vmem %s1585_s2, %s1218_s11  ;;  %s382_s17 = scalar_lea.vmem %s1586_s3, %s1218_s11 }
  0x10   : > { %v1228_v1 = vld.sshfl [vmem:[%s378_s14] sm:$0x3 pattern:$0x76325410]  ;;  %s374_s20 = scalar_lea.vmem %s1584_s1, %s1218_s11  ;;  %s370_s23 = scalar_lea.vmem %s1583_s0, %s1218_s11 }
  0x11   : > { %v393_v2 = vld [vmem:[%s382_s17] sm:$0x3]  ;;  %413 = vrot.lane.b32.xlu0 %v1228_v1, %s1405_s24  ;;  %s387_s16 = scalar_lea.vmem %s1591_s8, %s1275_s13  ;;  %s1224_s19 = sshll.u32 %s1594_s10, 2 }
  0x12   : > { %v1235_v3 = vld.sshfl [vmem:[%s382_s17] sm:$0x3 pattern:$0x76325410]  ;;  %v473_v4 = vsel %vm419_vm1, %v393_v2, 0  ;;  %s391_s22 = scalar_lea.vmem %s1592_s9, %s1224_s19 }
  0x13   : > { %v1240_v6 = vld.sshfl [vmem:[%s374_s20] sm:$0x3 pattern:$0x76325410]  ;;  %1305 = vmatpush3.bf16.msra.mxu1 %v473_v4 }
  0x14   : > { %601 = vrot.lane.b32.xlu1 %v1240_v6, %s1406_s27  ;;  %v1245_v7 = vld.sshfl [vmem:[%s370_s23] sm:$0x3 pattern:$0x76325410]  ;;  %1316 = vmatprep.subr.bf16.mxu1 %v1403_v0 }
  0x15   : > { %533 = vrot.lane.b32.xlu0 %v1235_v3, %s1405_s24 }
  0x16   : > { %1307 = vmatmul.mubr.msk.bf16.vlgmr.msra.gmra.mrb[0].mxu1 %vm415_vm2, %v1375_v5 }
  0x17   : > { %1318 = vmatprep.mubr.msk.bf16.mxu1 %vm1404_vm0, %v1403_v0 }
  0x18   : > { %669 = vrot.lane.b32.xlu1 %v1245_v7, %s1407_s28 }
  0x19   : > { %737 = vrot.lane.b32.xlu0 %v1240_v6, %s1407_s28 }
  0x1c   : > { %805 = vrot.lane.b32.xlu1 %v1235_v3, %s1406_s27 }
  0x1d   : > { %873 = vrot.lane.b32.xlu0 %v1228_v1, %s1407_s28 }
  0x20   : > { %941 = vrot.lane.b32.xlu1 %v1235_v3, %s1407_s28 }
  0x21   : > { %996 = vperm.xlu0 %1372, %v992_v9  }
  0x24   : > { %1001 = vperm.xlu1 %1373, %v993_v8  }
  0x28   : > { %1035 = vperm.xlu1 %1373, %v1032_v11  }
  0x83   : > { %v414_v12 = vpop.permute.xlu0 %413 }
  0x84   : > { %v421_v13 = vsel %vm419_vm1, %v414_v12, 0 }
  0x85   : > { %1299 = vmatpush3.bf16.msra.mxu0 %v421_v13 }
  0x86   : > { %v602_v15 = vpop.permute.xlu1 %601  ;;  %1310 = vmatprep.subr.bf16.mxu0 %v1403_v0 }
  0x87   : > { %v607_v16 = vsel %vm419_vm1, %v602_v15, 0  ;;  %v534_v18 = vpop.permute.xlu0 %533 }
  0x88   : > { %1317 = vmatpush3.bf16.msra.mxu1 %v607_v16  ;;  %1301 = vmatmul.mubr.msk.bf16.vlgmr.msra.gmra.mrb[0].mxu0 %vm415_vm2, %v1374_v14  ;;  %v539_v19 = vsel %vm419_vm1, %v534_v18, 0 }
  0x89   : > { %1328 = vmatprep.subr.bf16.mxu1 %v1403_v0  ;;  %1311 = vmatpush3.bf16.msra.mxu0 %v539_v19 }
  0x8a   : > { %1312 = vmatprep.mubr.msk.bf16.mxu0 %vm1404_vm0, %v1403_v0  ;;  %1322 = vmatprep.subr.bf16.mxu0 %v1403_v0  ;;  %v670_v20 = vpop.permute.xlu1 %669 }
  0x8b   : > { %1319 = vmatmul.mubr.msk.bf16.vlgmr.msra.gmra.mrb[4].mxu1 %vm415_vm2, %v1377_v17  ;;  %v738_v21 = vpop.permute.xlu0 %737  ;;  %v675_v24 = vsel %vm419_vm1, %v670_v20, 0 }
  0x8c   : > { %1330 = vmatprep.mubr.msk.bf16.mxu1 %vm1404_vm0, %v1403_v0  ;;  %v743_v23 = vsel %vm419_vm1, %v738_v21, 0 }
  0x8d   : > { %1329 = vmatpush3.bf16.msra.mxu1 %v743_v23 }
  0x8e   : > { %1340 = vmatprep.subr.bf16.mxu1 %v1403_v0  ;;  %v806_v28 = vpop.permute.xlu1 %805 }
  0x8f   : > { %v874_v26 = vpop.permute.xlu0 %873  ;;  %v811_v30 = vsel %vm419_vm1, %v806_v28, 0 }
  0x90   : > { %1313 = vmatmul.mubr.msk.bf16.vlgmr.msra.gmra.mrb[4].mxu0 %vm415_vm2, %v1376_v22  ;;  %v879_v27 = vsel %vm419_vm1, %v874_v26, 0 }
  0x91   : > { %1323 = vmatpush3.bf16.msra.mxu0 %v675_v24  ;;  %1324 = vmatprep.mubr.msk.bf16.mxu0 %vm1404_vm0, %v1403_v0 }
  0x92   : > { %1334 = vmatprep.subr.bf16.mxu0 %v1403_v0  ;;  %v942_v32 = vpop.permute.xlu1 %941 }
  0x93   : > { %1331 = vmatmul.mubr.msk.bf16.vlgmr.msra.gmra.mrb[8].mxu1 %vm415_vm2, %v1379_v25  ;;  %v947_v34 = vsel %vm419_vm1, %v942_v32, 0 }
  0x94   : > { %1341 = vmatpush3.bf16.msra.mxu1 %v879_v27  ;;  %1342 = vmatprep.mubr.msk.bf16.mxu1 %vm1404_vm0, %v1403_v0 }
  0x95   : > { %1352 = vmatprep.subr.bf16.mxu1 %v1403_v0 }
  0x98   : > { %1325 = vmatmul.mubr.msk.bf16.vlgmr.msra.gmra.mrb[8].mxu0 %vm415_vm2, %v1378_v29 }
  0x99   : > { %1335 = vmatpush3.bf16.msra.mxu0 %v811_v30  ;;  %1336 = vmatprep.mubr.msk.bf16.mxu0 %vm1404_vm0, %v1403_v0 }
  0x9a   : > { %1346 = vmatprep.subr.bf16.mxu0 %v1403_v0 }
  0x9b   : > { %1343 = vmatmul.mubr.msk.bf16.vlgmr.msra.gmra.mrb[12].mxu1 %vm415_vm2, %v1381_v31 }
  0x9c   : > { %1354 = vmatprep.mubr.msk.bf16.mxu1 %vm1404_vm0, %v1403_v0 }
  0xa0   : > { %1337 = vmatmul.mubr.msk.bf16.vlgmr.msra.gmra.mrb[12].mxu0 %vm415_vm2, %v1380_v33  ;;  %v997_v19 = vpop.permute.xlu0 %996 }
  0xa1   : > { %1347 = vmatpush3.bf16.msra.mxu0 %v947_v34  ;;  %1348 = vmatprep.mubr.msk.bf16.mxu0 %vm1404_vm0, %v1403_v0 }
  0xa3   : > { %v1002_v26 = vpop.permute.xlu1 %1001 }
  0xa8   : > { %1349 = vmatmul.mubr.msk.bf16.vlgmr.msra.gmra.mrb[16].mxu0 %vm415_vm2, %v1382_v35 }
  0xe9   : > { %v509_v36 = vpop.f32.mrb[0].mxu1 }
  0xea   : > { %v1308_v37 = vpop.f32.mrb[1].mxu1 }
  0xeb   : > { %v512_v38 = vpop.f32.mrb[2].mxu1 }
  0xec   : > { %v1309_v39 = vpop.f32.mrb[3].mxu1 }
 0x15b   : > { %v457_v40 = vpop.f32.mrb[0].mxu0 }
 0x15c   : > { %v510_v41 = vadd.f32 %v509_v36, %v457_v40  ;;  %v1302_v42 = vpop.f32.mrb[1].mxu0 }
 0x15d   : > { %v460_v43 = vpop.f32.mrb[2].mxu0  ;;  %v1036_v42 = vpop.permute.xlu1 %1035 }
 0x15e   : > { %v643_v44 = vpop.f32.mrb[4].mxu1  ;;  %v513_v45 = vadd.f32 %v512_v38, %v460_v43  ;;  %v1303_v46 = vpop.f32.mrb[3].mxu0 }
 0x15f   : > { %v1320_v47 = vpop.f32.mrb[5].mxu1 }
 0x160   : > { %v646_v48 = vpop.f32.mrb[6].mxu1 }
 0x161   : > { %v1321_v49 = vpop.f32.mrb[7].mxu1 }
 0x163   : > { %v575_v50 = vpop.f32.mrb[4].mxu0 }
 0x164   : > { %v582_v51 = vadd.f32 %v575_v50, %v510_v41  ;;  %v1314_v52 = vpop.f32.mrb[5].mxu0  ;;  %v1031_v41 = vld [vmem:[%s1589_s6] sm:$0xf] }
 0x165   : > { %v578_v53 = vpop.f32.mrb[6].mxu0 }
 0x166   : > { %v779_v54 = vpop.f32.mrb[8].mxu1  ;;  %v583_v55 = vadd.f32 %v578_v53, %v513_v45  ;;  %v650_v56 = vadd.f32 %v643_v44, %v582_v51  ;;  %v1315_v57 = vpop.f32.mrb[7].mxu0 }
 0x167   : > { %v1332_v58 = vpop.f32.mrb[9].mxu1 }
 0x168   : > { %v782_v59 = vpop.f32.mrb[10].mxu1  ;;  %v651_v60 = vadd.f32 %v646_v48, %v583_v55 }
 0x169   : > { %v1333_v61 = vpop.f32.mrb[11].mxu1 }
 0x16b   : > { %v711_v62 = vpop.f32.mrb[8].mxu0 }
 0x16c   : > { %v718_v63 = vadd.f32 %v711_v62, %v650_v56  ;;  %v1326_v0 = vpop.f32.mrb[9].mxu0 }
 0x16d   : > { %v714_v1 = vpop.f32.mrb[10].mxu0 }
 0x16e   : > { %v915_v2 = vpop.f32.mrb[12].mxu1  ;;  %v719_v3 = vadd.f32 %v714_v1, %v651_v60  ;;  %v786_v4 = vadd.f32 %v779_v54, %v718_v63  ;;  %v1327_v5 = vpop.f32.mrb[11].mxu0 }
 0x16f   : > { %v1344_v6 = vpop.f32.mrb[13].mxu1 }
 0x170   : > { %v918_v7 = vpop.f32.mrb[14].mxu1  ;;  %v787_v8 = vadd.f32 %v782_v59, %v719_v3 }
 0x171   : > { %v1345_v9 = vpop.f32.mrb[15].mxu1 }
 0x173   : > { %v847_v10 = vpop.f32.mrb[12].mxu0 }
 0x174   : > { %v854_v11 = vadd.f32 %v847_v10, %v786_v4  ;;  %v1338_v12 = vpop.f32.mrb[13].mxu0 }
 0x175   : > { %v850_v13 = vpop.f32.mrb[14].mxu0 }
 0x176   : > { %v855_v14 = vadd.f32 %v850_v13, %v787_v8  ;;  %v922_v15 = vadd.f32 %v915_v2, %v854_v11  ;;  %v1339_v16 = vpop.f32.mrb[15].mxu0 }
 0x178   : > { %v923_v17 = vadd.f32 %v918_v7, %v855_v14 }
 0x17b   : > { %v983_v18 = vpop.f32.mrb[16].mxu0 }
 0x17c   : > { %v990_v20 = vadd.f32 %v983_v18, %v922_v15  ;;  %v1350_v21 = vpop.f32.mrb[17].mxu0 }
 0x17d   : > { %v986_v22 = vpop.f32.mrb[18].mxu0 }
 0x17e   : > { %v1004_v23 = vadd.f32 %v997_v19, %v990_v20  ;;  %v991_v24 = vadd.f32 %v986_v22, %v923_v17  ;;  %v1351_v25 = vpop.f32.mrb[19].mxu0 }
 0x180   : > { %v1267_v27 = vmul.f32 -1.442695, %v1004_v23  ;;  %v1005_v28 = vadd.f32 %v1002_v26, %v991_v24 }
 0x182   : > { %1383 = vpow2.f32 %v1267_v27  ;;  %v1268_v29 = vmul.f32 -1.442695, %v1005_v28 }
 0x184   : > { %1385 = vpow2.f32 %v1268_v29 }
 0x18c   : > { %v1384_v30 = vpop.eup %1383 }
 0x18d   : > { %v1012_v31 = vadd.f32 1.0, %v1384_v30 }
 0x18e   : > { %v1386_v32 = vpop.eup %1385 }
 0x18f   : > { %1387 = vrcp.f32 %v1012_v31  ;;  %v1013_v33 = vadd.f32 1.0, %v1386_v32 }
 0x191   : > { %1389 = vrcp.f32 %v1013_v33 }
 0x199   : > { %v1388_v34 = vpop.eup %1387 }
 0x19a   : > { %v1018_v35 = vmul.f32 %v1388_v34, %v1004_v23 }
 0x19b   : > { %v1390_v36 = vpop.eup %1389 }
 0x19c   : > { %v1276_v37 = vpack.c.bf16 %v1018_v35, %v1018_v35  ;;  %v1019_v38 = vmul.f32 %v1390_v36, %v1005_v28 }
 0x19e   : > { %1029 = vst.msk [vmem:[%s387_s16] sm:$0xf] %vm1028_vm3, %v1276_v37  ;;  %v1020_v39 = vpack.c.bf16 %v1019_v38, %v1018_v35  ;;  %v1277_v40 = vpack.c.bf16 %v1019_v38, %v1019_v38 }
 0x1a0   : > { %1030 = vst.msk [vmem:[%s387_s16 + $0x4] sm:$0xf] %vm1028_vm3, %v1277_v40  ;;  %1353 = vmatpush3.bf16.msra.mxu1 %v1020_v39 }
 0x1a3   : > { %1355 = vmatmul.mubr.msk.bf16.vlgmr.msra.gmra.mrb[16].mxu1 %vm1038_vm4, %v1031_v41 }
 0x276   : > { %v1076_v43 = vpop.f32.mrb[16].mxu1 }
 0x277   : > { %v1077_v44 = vadd.f32 %v1076_v43, %v1036_v42  ;;  %v1356_v45 = vpop.f32.mrb[17].mxu1 }
 0x278   : > { %v1079_v46 = vpop.f32.mrb[18].mxu1 }
 0x279   : > { %v1272_v47 = vmul.f32 -1.442695, %v1077_v44  ;;  %v1357_v48 = vpop.f32.mrb[19].mxu1 }
 0x27b   : > { %1391 = vpow2.f32 %v1272_v47 }
 0x285   : > { %v1392_v49 = vpop.eup %1391 }
 0x286   : > { %v1085_v50 = vadd.f32 1.0, %v1392_v49 }
 0x288   : > { %1393 = vrcp.f32 %v1085_v50 }
 0x292   : > { %v1394_v51 = vpop.eup %1393 }
 0x293   : > { %v1088_v52 = vmul.f32 %v1394_v51, %v1077_v44 }
 0x295   : > { %v1089_v53 = vpack.c.bf16 %v1088_v52, %v1088_v52 }
 0x297   : > { %1090 = vst.msk [vmem:[%s391_s22] sm:$0xf] %vm1028_vm3, %v1089_v53 }
 0x298 PF: > { %s20_s30 = sadd.s32 1, %s1401_s30  }
 0x299   : > { %p17_p4 = scmp.ge.s32.totalorder %s20_s30, 4  }
 0x29b   :  { %19 = sbr.rel (!%p17_p4) target bundleno = 1 (0x1), region = 111 }

// kernel: stem_block_forward.5
= control target key start
LH: loop header
LB: loop body
LE: loop exit
PB: predicated region body
PF: predicated region fallthrough
CT: control target
= control target key end

     0   :  { %s675_s18 = smov 0   ;;  %s677_s19 = smov 0   ;;  %s727_s0 = inlined_call_operand.vmem [shape: bf16[2,16,128], index: 0, kind: input, shape index: {}]   ;;  %s728_s1 = inlined_call_operand.vmem [shape: bf16[2,16,128], index: 1, kind: input, shape index: {}]   ;;  %s729_s2 = inlined_call_operand.vmem [shape: bf16[16,16], index: 2, kind: input, shape index: {}]   ;;  %s730_s3 = inlined_call_operand.vmem [shape: bf16[16,16], index: 3, kind: input, shape index: {}]   ;;  %s731_s4 = inlined_call_operand.vmem [shape: f32[16,1], index: 4, kind: input, shape index: {}]   ;;  %s732_s5 = inlined_call_operand.vmem [shape: f32[2,16,128], index: 5, kind: output, shape index: {}]  }
   0x1   :  { %s679_s20 = smov 0  }
   0x2 LB: > { %s27_s21 = sadd.s32 1, %s636_s19  ;;  %p542_p0 = scmp.ge.s32.totalorder %s640_s20, 1  ;;  %s640_s20 = sphi %s679_s20, %s15_s20   ;;  %s636_s19 = sphi %s677_s19, %s734_s19   ;;  %s632_s18 = sphi %s675_s18, %s733_s18  }
   0x3   : > { %p29_p1 = scmp.ge.s32.totalorder %s27_s21, 2  ;;  %p221_p2 = scmp.lt.s32.totalorder %s640_s20, 3 }
   0x5   : > { %s736_s21 = smov (%p29_p1, %s27_s21), 0  ;;  %p222_p3 = pnand %p542_p0, %p221_p2 }
   0x6   : > { %p263_p4 = scmp.lt.s32.totalorder (!%p222_p3), %s632_s18, 1  ;;  %v642_v0 = vmov (!%p222_p3), 0.0   ;;  %vm643_vm0 = vmmov (!%p222_p3), 0   ;;  %v407_v1 = vld [vmem:[%s731_s4] sm:$0xff] (!%p222_p3)  ;;  %v644_v2 = vmov (!%p222_p3), 0   ;;  %v408_v4 = vld [vmem:[%s731_s4 + $0x8] sm:$0xff] (!%p222_p3) }
   0x7   : > { %225 = sbr.rel (%p222_p3) target bundleno = 269 (0x10d), region = 40  ;;  %566 = vmatprep.subr.bf16.mxu0 (!%p222_p3), %v642_v0  ;;  %572 = vmatprep.subr.bf16.mxu1 (!%p222_p3), %v642_v0  ;;  %v608_v3 = vld [vmem:[%s730_s3] sm:$0xff] (!%p222_p3)   ;;  %vm307_vm1 = vcmask (!%p222_p3), 130048  }
   0x8   : > { %568 = vmatprep.mubr.msk.bf16.mxu0 (!%p222_p3), %vm643_vm0, %v642_v0  ;;  %574 = vmatprep.mubr.msk.bf16.mxu1 (!%p222_p3), %vm643_vm0, %v642_v0  ;;  %v609_v7 = vld [vmem:[%s729_s2] sm:$0xff] (!%p222_p3)  }
   0x9   : > { %605 = vset.pattern.permute.xlu0 (!%p222_p3), %v644_v2 }
   0xa   : > { %411 = vperm.xlu0 (!%p222_p3), %605, %v407_v1  }
   0xe   : > { %s738_s18 = smov (!%p263_p4, %s632_s18), 1  ;;  %416 = vperm.xlu0 %605, %v408_v4  }
   0xf   : > { %s559_s24 = sshll.u32 %s738_s18, 3  ;;  %s561_s12 = sshll.u32 %s738_s18, 4 }
  0x10   : > { %s278_s27 = scalar_lea.vmem %s728_s1, %s559_s24  ;;  %s270_s30 = scalar_lea.vmem %s727_s0, %s559_s24 }
  0x11   : > { %v606_v5 = vld [vmem:[%s278_s27] sm:$0xff]   ;;  %s286_s15 = scalar_lea.vmem %s732_s5, %s561_s12 }
  0x12   : > { %v607_v6 = vld [vmem:[%s270_s30] sm:$0xff]   ;;  %567 = vmatpush3.bf16.msra.mxu0 %v606_v5 }
  0x13   : > { %573 = vmatpush3.bf16.msra.mxu1 %v607_v6 }
  0x15   : > { %569 = vmatmul.mubr.msk.bf16.vlgmr.msra.gmra.mrb[0].mxu0 %vm307_vm1, %v608_v3 }
  0x16   : > { %575 = vmatmul.mubr.msk.bf16.vlgmr.msra.gmra.mrb[0].mxu1 %vm307_vm1, %v609_v7 }
  0x89   : > { %v412_v8 = vpop.permute.xlu0 %411 }
  0x8d   : > { %v417_v20 = vpop.permute.xlu0 %416 }
  0xe8   : > { %v345_v9 = vpop.f32.mrb[0].mxu0 }
  0xe9   : > { %v400_v10 = vpop.f32.mrb[0].mxu1  ;;  %v570_v11 = vpop.f32.mrb[1].mxu0 }
  0xea   : > { %v401_v12 = vadd.f32 %v400_v10, %v345_v9  ;;  %v576_v13 = vpop.f32.mrb[1].mxu1  ;;  %v348_v14 = vpop.f32.mrb[2].mxu0 }
  0xeb   : > { %v403_v15 = vpop.f32.mrb[2].mxu1  ;;  %v571_v16 = vpop.f32.mrb[3].mxu0 }
  0xec   : > { %v419_v17 = vadd.f32 %v412_v8, %v401_v12  ;;  %v404_v18 = vadd.f32 %v403_v15, %v348_v14  ;;  %v577_v19 = vpop.f32.mrb[3].mxu1 }
  0xee   : > { %v555_v21 = vmul.f32 -1.442695, %v419_v17  ;;  %v420_v22 = vadd.f32 %v417_v20, %v404_v18 }
  0xf0   : > { %610 = vpow2.f32 %v555_v21  ;;  %v556_v23 = vmul.f32 -1.442695, %v420_v22 }
  0xf2   : > { %612 = vpow2.f32 %v556_v23 }
  0xfa   : > { %v611_v24 = vpop.eup %610 }
  0xfb   : > { %v427_v25 = vadd.f32 1.0, %v611_v24 }
  0xfc   : > { %v613_v26 = vpop.eup %612 }
  0xfd   : > { %614 = vrcp.f32 %v427_v25  ;;  %v428_v27 = vadd.f32 1.0, %v613_v26 }
  0xff   : > { %616 = vrcp.f32 %v428_v27 }
 0x107   : > { %v615_v28 = vpop.eup %614 }
 0x108   : > { %v433_v29 = vmul.f32 %v615_v28, %v419_v17 }
 0x109   : > { %v617_v30 = vpop.eup %616 }
 0x10a   : > { %435 = vst [vmem:[%s286_s15] sm:$0xff] %v433_v29  ;;  %v434_v31 = vmul.f32 %v617_v30, %v420_v22 }
 0x10c   : > { %436 = vst [vmem:[%s286_s15 + $0x8] sm:$0xff] %v434_v31 }
 0x10d PF: > { %s15_s20 = sadd.s32 1, %s640_s20   ;;  %s733_s18 = smov %s636_s19 }
 0x10e   : > { %p12_p5 = scmp.ge.s32.totalorder %s15_s20, 4   ;;  %s734_s19 = smov %s736_s21 }
 0x110   :  { %14 = sbr.rel (!%p12_p5) target bundleno = 2 (0x2), region = 73 }

</bundles_post_ra>
